<compile_context>
chip_gen: v7x
topology: tpu7x:2x2x1
jax: 0.10.0
libtpu: 0.0.40
codegen_flags: <defaults>
</compile_context>

<pallas_src>
import jax
import jax.numpy as jnp
from jax.experimental import pallas as pl
from jax.experimental.pallas import tpu as pltpu


def gru_recurrence_kernel(wx_r_ref, wx_z_ref, wx_n_ref,
                          whh_r_ref, whh_z_ref, whh_n_ref,
                          bhh_n_ref, h_out_ref, h_ref):
    """One grid step = TB timesteps of the GRU recurrence.

    wx_* blocks : (TB, N, H)  precomputed input projections (+ folded biases)
    whh_*       : (H, H)      transposed recurrent weights (grid-invariant)
    bhh_n       : (1, H)      n-gate hidden bias (must stay inside r*(...))
    h_out block : (TB, N, H)  per-step hidden states (consumed by the head)
    h_ref       : (N, H)      VMEM scratch, hidden state carried across steps
    """
    tb = pl.program_id(0)

    @pl.when(tb == 0)
    def _():
        h_ref[...] = jnp.zeros_like(h_ref)          # h0 = zeros(N, H)

    # Hoist grid-invariant loads out of the inner loop.
    whh_r = whh_r_ref[...]
    whh_z = whh_z_ref[...]
    whh_n = whh_n_ref[...]
    b_n = bhh_n_ref[...]

    TB = wx_r_ref.shape[0]

    def step(i, h):
        r = jax.nn.sigmoid(
            wx_r_ref[i]
            + jnp.dot(h, whh_r, preferred_element_type=jnp.float32))
        z = jax.nn.sigmoid(
            wx_z_ref[i]
            + jnp.dot(h, whh_z, preferred_element_type=jnp.float32))
        n = jnp.tanh(
            wx_n_ref[i]
            + r * (jnp.dot(h, whh_n, preferred_element_type=jnp.float32) + b_n))
        h_new = (1.0 - z) * n + z * h
        h_out_ref[i] = h_new.astype(h_out_ref.dtype)
        return h_new

    # Short fixed trip count -> fully unrolled for LLO scheduler visibility.
    h_ref[...] = jax.lax.fori_loop(0, TB, step, h_ref[...], unroll=True)


def linear_kernel(x_ref, w_ref, b_ref, o_ref):
    """Batched regression head: (TM, H) @ (H, O) + b, one tile per grid step."""
    o_ref[...] = (
        jnp.dot(x_ref[...], w_ref[...], preferred_element_type=jnp.float32)
        + b_ref[...]).astype(o_ref.dtype)


def _linear(x, w_t, b_row):
    """x: (M, H), w_t: (H, O), b_row: (1, O) -> (M, O) via a Pallas matmul."""
    M, H = x.shape
    O = w_t.shape[1]
    TM = M if M <= 512 else 512
    n_m = pl.cdiv(M, TM)
    M_pad = n_m * TM
    if M_pad != M:
        x = jnp.pad(x, ((0, M_pad - M), (0, 0)))

    out = pl.pallas_call(
        linear_kernel,
        out_shape=jax.ShapeDtypeStruct((M_pad, O), jnp.float32),
        grid_spec=pltpu.PrefetchScalarGridSpec(
            num_scalar_prefetch=0,
            grid=(n_m,),
            in_specs=[
                pl.BlockSpec((TM, H), lambda i: (i, 0)),
                pl.BlockSpec((H, O), lambda i: (0, 0)),
                pl.BlockSpec((1, O), lambda i: (0, 0)),
            ],
            out_specs=pl.BlockSpec((TM, O), lambda i: (i, 0)),
        ),
        compiler_params=pltpu.CompilerParams(
            dimension_semantics=("parallel",)),
    )(x, w_t, b_row)
    return out[:M]


def gru_forward(src, w_ih, w_hh, b_ih, b_hh, w_reg, b_reg, *, time_block=32):
    """src: (N, T, C) float32. Returns (N, T, out_size). Matches the PyTorch GRU."""
    N, T, C = src.shape
    H = w_ih.shape[0] // 3
    O = w_reg.shape[0]

    # ---- split weights/biases per gate (no 3H lane-slicing inside kernel) ----
    w_ih_r, w_ih_z, w_ih_n = w_ih[:H], w_ih[H:2 * H], w_ih[2 * H:]
    w_hh_r, w_hh_z, w_hh_n = w_hh[:H], w_hh[H:2 * H], w_hh[2 * H:]
    b_r = (b_ih[:H] + b_hh[:H]).reshape(1, 1, H)           # fold r biases
    b_z = (b_ih[H:2 * H] + b_hh[H:2 * H]).reshape(1, 1, H)  # fold z biases
    b_in = b_ih[2 * H:].reshape(1, 1, H)                    # n input-bias only
    b_hn = b_hh[2 * H:].reshape(1, H)                       # n hidden-bias -> kernel

    # ---- hoisted input projection: one big matmul per gate (XLA, MXU-friendly) ----
    # time-major (T, N, H) so the kernel indexes timesteps on the leading axis.
    wx_r = jnp.einsum('ntc,hc->tnh', src, w_ih_r) + b_r
    wx_z = jnp.einsum('ntc,hc->tnh', src, w_ih_z) + b_z
    wx_n = jnp.einsum('ntc,hc->tnh', src, w_ih_n) + b_in

    # ---- block the time axis ----
    TB = min(time_block, T)
    n_tb = pl.cdiv(T, TB)
    T_pad = n_tb * TB
    if T_pad != T:
        pad = ((0, T_pad - T), (0, 0), (0, 0))
        wx_r = jnp.pad(wx_r, pad)
        wx_z = jnp.pad(wx_z, pad)
        wx_n = jnp.pad(wx_n, pad)

    h_all = pl.pallas_call(
        gru_recurrence_kernel,
        out_shape=jax.ShapeDtypeStruct((T_pad, N, H), jnp.float32),
        grid_spec=pltpu.PrefetchScalarGridSpec(
            num_scalar_prefetch=0,
            grid=(n_tb,),
            in_specs=[
                pl.BlockSpec((TB, N, H), lambda t: (t, 0, 0)),  # wx_r
                pl.BlockSpec((TB, N, H), lambda t: (t, 0, 0)),  # wx_z
                pl.BlockSpec((TB, N, H), lambda t: (t, 0, 0)),  # wx_n
                pl.BlockSpec((H, H), lambda t: (0, 0)),         # w_hh_r^T
                pl.BlockSpec((H, H), lambda t: (0, 0)),         # w_hh_z^T
                pl.BlockSpec((H, H), lambda t: (0, 0)),         # w_hh_n^T
                pl.BlockSpec((1, H), lambda t: (0, 0)),         # b_hh_n
            ],
            out_specs=pl.BlockSpec((TB, N, H), lambda t: (t, 0, 0)),
            scratch_shapes=[pltpu.VMEM((N, H), jnp.float32)],   # hidden state
        ),
        compiler_params=pltpu.CompilerParams(
            dimension_semantics=("arbitrary",)),                 # sequential in T
    )(wx_r, wx_z, wx_n, w_hh_r.T, w_hh_z.T, w_hh_n.T, b_hn)

    # ---- regression head: one batched matmul over all timesteps ----
    h_flat = h_all[:T].reshape(T * N, H)
    out_flat = _linear(h_flat, w_reg.T, b_reg.reshape(1, O))
    return jnp.transpose(out_flat.reshape(T, N, O), (1, 0, 2))   # (N, T, O)


def gru_reference(src, w_ih, w_hh, b_ih, b_hh, w_reg, b_reg):
    """Pure-JAX reference mirroring the PyTorch module."""
    N, T, C = src.shape
    H = w_ih.shape[0] // 3

    def step(h, x):
        wx = x @ w_ih.T
        wh = h @ w_hh.T
        r = jax.nn.sigmoid(wx[:, :H] + wh[:, :H] + b_ih[:H] + b_hh[:H])
        z = jax.nn.sigmoid(wx[:, H:2 * H] + wh[:, H:2 * H]
                           + b_ih[H:2 * H] + b_hh[H:2 * H])
        n = jnp.tanh(wx[:, 2 * H:] + b_ih[2 * H:] + r * (wh[:, 2 * H:] + b_hh[2 * H:]))
        h_new = (1 - z) * n + z * h
        return h_new, h_new

    h0 = jnp.zeros((N, H), jnp.float32)
    _, hs = jax.lax.scan(step, h0, jnp.transpose(src, (1, 0, 2)))
    out = jnp.transpose(hs, (1, 0, 2))               # (N, T, H)
    return out @ w_reg.T + b_reg


if __name__ == "__main__":
    # Small shapes consistent with the module's forward.
    N, T = 2, 8            # batch, seq
    C = 4                  # input_size
    H = 32                 # hidden_size
    O = 8                  # out_size

    key = jax.random.PRNGKey(0)
    k1, k2, k3, k4, k5, k6, k7 = jax.random.split(key, 7)
    src = jax.random.normal(k1, (N, T, C), jnp.float32)
    w_ih = 0.1 * jax.random.normal(k2, (3 * H, C), jnp.float32)
    w_hh = 0.1 * jax.random.normal(k3, (3 * H, H), jnp.float32)
    b_ih = 0.1 * jax.random.normal(k4, (3 * H,), jnp.float32)
    b_hh = 0.1 * jax.random.normal(k5, (3 * H,), jnp.float32)
    w_reg = 0.1 * jax.random.normal(k6, (O, H), jnp.float32)
    b_reg = 0.1 * jax.random.normal(k7, (O,), jnp.float32)

    out = gru_forward(src, w_ih, w_hh, b_ih, b_hh, w_reg, b_reg)
    out = jax.block_until_ready(out)

    ref = gru_reference(src, w_ih, w_hh, b_ih, b_hh, w_reg, b_reg)
    assert out.shape == (N, T, O)
    assert jnp.allclose(out, ref, atol=1e-5, rtol=1e-5), \
        float(jnp.max(jnp.abs(out - ref)))

    print("KERNEL_OK")
</pallas_src>

<mosaic_0001>
module attributes {stable_mosaic.version = 11 : i64} {
  func.func @gru_recurrence_kernel(%arg0: i32, %arg1: memref<8x2x32xf32, #tpu.memory_space<vmem>>, %arg2: memref<8x2x32xf32, #tpu.memory_space<vmem>>, %arg3: memref<8x2x32xf32, #tpu.memory_space<vmem>>, %arg4: memref<32x32xf32, #tpu.memory_space<vmem>>, %arg5: memref<32x32xf32, #tpu.memory_space<vmem>>, %arg6: memref<32x32xf32, #tpu.memory_space<vmem>>, %arg7: memref<1x32xf32, #tpu.memory_space<vmem>>, %arg8: memref<8x2x32xf32, #tpu.memory_space<vmem>>, %arg9: memref<2x32xf32, #tpu.memory_space<vmem>>) attributes {dimension_semantics = [#tpu.dimension_semantics<arbitrary>], iteration_bounds = array<i64: 1>, scalar_prefetch = 0 : i64, scratch_operands = 1 : i64, tpu.core_type = #tpu.core_type<tc>, window_params = [{transform_indices = @transform_0, window_bounds = array<i64: 8, 2, 32>}, {transform_indices = @transform_1, window_bounds = array<i64: 8, 2, 32>}, {transform_indices = @transform_2, window_bounds = array<i64: 8, 2, 32>}, {pipeline_mode = #tpu.pipeline_mode<synchronous>, transform_indices = @transform_3, window_bounds = array<i64: 32, 32>}, {pipeline_mode = #tpu.pipeline_mode<synchronous>, transform_indices = @transform_4, window_bounds = array<i64: 32, 32>}, {pipeline_mode = #tpu.pipeline_mode<synchronous>, transform_indices = @transform_5, window_bounds = array<i64: 32, 32>}, {pipeline_mode = #tpu.pipeline_mode<synchronous>, transform_indices = @transform_6, window_bounds = array<i64: 1, 32>}, {transform_indices = @transform_7, window_bounds = array<i64: 8, 2, 32>}]} {
    %c0_i32 = arith.constant 0 : i32
    %0 = arith.cmpi eq, %arg0, %c0_i32 : i32
    %1 = arith.extui %0 : i1 to i32
    %c0_i32_0 = arith.constant 0 : i32
    %2 = arith.cmpi ne, %1, %c0_i32_0 : i32
    scf.if %2 {
      %cst_124 = arith.constant 0.000000e+00 : f32
      %313 = vector.broadcast %cst_124 : f32 to vector<2x32xf32>
      %c0_125 = arith.constant 0 : index
      %c0_126 = arith.constant 0 : index
      %314 = vector.load %arg9[%c0_125, %c0_126] : memref<2x32xf32, #tpu.memory_space<vmem>>, vector<2x32xf32>
      tpu.vector_store %arg9[%c0_125, %c0_126], %313 {strides = array<i32>} : memref<2x32xf32, #tpu.memory_space<vmem>>, vector<2x32xf32>,
    } else {
    }
    %c0 = arith.constant 0 : index
    %c0_1 = arith.constant 0 : index
    %3 = vector.load %arg4[%c0, %c0_1] : memref<32x32xf32, #tpu.memory_space<vmem>>, vector<32x32xf32>
    %c0_2 = arith.constant 0 : index
    %c0_3 = arith.constant 0 : index
    %4 = vector.load %arg5[%c0_2, %c0_3] : memref<32x32xf32, #tpu.memory_space<vmem>>, vector<32x32xf32>
    %c0_4 = arith.constant 0 : index
    %c0_5 = arith.constant 0 : index
    %5 = vector.load %arg6[%c0_4, %c0_5] : memref<32x32xf32, #tpu.memory_space<vmem>>, vector<32x32xf32>
    %c0_6 = arith.constant 0 : index
    %c0_7 = arith.constant 0 : index
    %6 = vector.load %arg7[%c0_6, %c0_7] : memref<1x32xf32, #tpu.memory_space<vmem>>, vector<1x32xf32>
    %c0_8 = arith.constant 0 : index
    %c0_9 = arith.constant 0 : index
    %7 = vector.load %arg9[%c0_8, %c0_9] : memref<2x32xf32, #tpu.memory_space<vmem>>, vector<2x32xf32>
    %c0_i32_10 = arith.constant 0 : i32
    %8 = arith.index_cast %c0_i32_10 : i32 to index
    %c0_11 = arith.constant 0 : index
    %c0_12 = arith.constant 0 : index
    %9 = vector.load %arg1[%8, %c0_11, %c0_12] : memref<8x2x32xf32, #tpu.memory_space<vmem>>, vector<1x2x32xf32>
    %10 = vector.shape_cast %9 : vector<1x2x32xf32> to vector<2x32xf32>
    %cst = arith.constant dense<0.000000e+00> : vector<2x32xf32>
    %11 = tpu.matmul %7, %3, %cst {dimension_numbers = #tpu.dot_dimension_numbers<[1], [0], [0], [1], [0, 0, 1, 1], [], []>} : vector<2x32xf32>, vector<32x32xf32>, vector<2x32xf32> -> vector<2x32xf32>
    %12 = arith.addf %10, %11 : vector<2x32xf32>
    %13 = arith.negf %12 : vector<2x32xf32>
    %14 = math.exp %13 : vector<2x32xf32>
    %cst_13 = arith.constant 1.000000e+00 : f32
    %15 = vector.broadcast %cst_13 : f32 to vector<2x32xf32>
    %16 = arith.addf %15, %14 : vector<2x32xf32>
    %17 = arith.divf %15, %16 : vector<2x32xf32>
    %18 = arith.index_cast %c0_i32_10 : i32 to index
    %c0_14 = arith.constant 0 : index
    %c0_15 = arith.constant 0 : index
    %19 = vector.load %arg2[%18, %c0_14, %c0_15] : memref<8x2x32xf32, #tpu.memory_space<vmem>>, vector<1x2x32xf32>
    %20 = vector.shape_cast %19 : vector<1x2x32xf32> to vector<2x32xf32>
    %cst_16 = arith.constant dense<0.000000e+00> : vector<2x32xf32>
    %21 = tpu.matmul %7, %4, %cst_16 {dimension_numbers = #tpu.dot_dimension_numbers<[1], [0], [0], [1], [0, 0, 1, 1], [], []>} : vector<2x32xf32>, vector<32x32xf32>, vector<2x32xf32> -> vector<2x32xf32>
    %22 = arith.addf %20, %21 : vector<2x32xf32>
    %23 = arith.negf %22 : vector<2x32xf32>
    %24 = math.exp %23 : vector<2x32xf32>
    %cst_17 = arith.constant 1.000000e+00 : f32
    %25 = vector.broadcast %cst_17 : f32 to vector<2x32xf32>
    %26 = arith.addf %25, %24 : vector<2x32xf32>
    %27 = arith.divf %25, %26 : vector<2x32xf32>
    %28 = arith.index_cast %c0_i32_10 : i32 to index
    %c0_18 = arith.constant 0 : index
    %c0_19 = arith.constant 0 : index
    %29 = vector.load %arg3[%28, %c0_18, %c0_19] : memref<8x2x32xf32, #tpu.memory_space<vmem>>, vector<1x2x32xf32>
    %30 = vector.shape_cast %29 : vector<1x2x32xf32> to vector<2x32xf32>
    %cst_20 = arith.constant dense<0.000000e+00> : vector<2x32xf32>
    %31 = tpu.matmul %7, %5, %cst_20 {dimension_numbers = #tpu.dot_dimension_numbers<[1], [0], [0], [1], [0, 0, 1, 1], [], []>} : vector<2x32xf32>, vector<32x32xf32>, vector<2x32xf32> -> vector<2x32xf32>
    %32 = vector.broadcast %6 : vector<1x32xf32> to vector<2x32xf32>
    %33 = arith.addf %31, %32 : vector<2x32xf32>
    %34 = arith.mulf %17, %33 : vector<2x32xf32>
    %35 = arith.addf %30, %34 : vector<2x32xf32>
    %36 = math.tanh %35 : vector<2x32xf32>
    %cst_21 = arith.constant 1.000000e+00 : f32
    %37 = vector.broadcast %cst_21 : f32 to vector<2x32xf32>
    %38 = arith.subf %37, %27 : vector<2x32xf32>
    %39 = arith.mulf %38, %36 : vector<2x32xf32>
    %40 = arith.mulf %27, %7 : vector<2x32xf32>
    %41 = arith.addf %39, %40 : vector<2x32xf32>
    %42 = arith.index_cast %c0_i32_10 : i32 to index
    %c0_22 = arith.constant 0 : index
    %c0_23 = arith.constant 0 : index
    %43 = vector.load %arg8[%42, %c0_22, %c0_23] : memref<8x2x32xf32, #tpu.memory_space<vmem>>, vector<1x2x32xf32>
    %44 = vector.shape_cast %43 : vector<1x2x32xf32> to vector<2x32xf32>
    %45 = vector.shape_cast %41 : vector<2x32xf32> to vector<1x2x32xf32>
    tpu.vector_store %arg8[%42, %c0_22, %c0_23], %45 {strides = array<i32>} : memref<8x2x32xf32, #tpu.memory_space<vmem>>, vector<1x2x32xf32>,
    %c1_i32 = arith.constant 1 : i32
    %46 = arith.index_cast %c1_i32 : i32 to index
    %c0_24 = arith.constant 0 : index
    %c0_25 = arith.constant 0 : index
    %47 = vector.load %arg1[%46, %c0_24, %c0_25] : memref<8x2x32xf32, #tpu.memory_space<vmem>>, vector<1x2x32xf32>
    %48 = vector.shape_cast %47 : vector<1x2x32xf32> to vector<2x32xf32>
    %cst_26 = arith.constant dense<0.000000e+00> : vector<2x32xf32>
    %49 = tpu.matmul %41, %3, %cst_26 {dimension_numbers = #tpu.dot_dimension_numbers<[1], [0], [0], [1], [0, 0, 1, 1], [], []>} : vector<2x32xf32>, vector<32x32xf32>, vector<2x32xf32> -> vector<2x32xf32>
    %50 = arith.addf %48, %49 : vector<2x32xf32>
    %51 = arith.negf %50 : vector<2x32xf32>
    %52 = math.exp %51 : vector<2x32xf32>
    %cst_27 = arith.constant 1.000000e+00 : f32
    %53 = vector.broadcast %cst_27 : f32 to vector<2x32xf32>
    %54 = arith.addf %53, %52 : vector<2x32xf32>
    %55 = arith.divf %53, %54 : vector<2x32xf32>
    %56 = arith.index_cast %c1_i32 : i32 to index
    %c0_28 = arith.constant 0 : index
    %c0_29 = arith.constant 0 : index
    %57 = vector.load %arg2[%56, %c0_28, %c0_29] : memref<8x2x32xf32, #tpu.memory_space<vmem>>, vector<1x2x32xf32>
    %58 = vector.shape_cast %57 : vector<1x2x32xf32> to vector<2x32xf32>
    %cst_30 = arith.constant dense<0.000000e+00> : vector<2x32xf32>
    %59 = tpu.matmul %41, %4, %cst_30 {dimension_numbers = #tpu.dot_dimension_numbers<[1], [0], [0], [1], [0, 0, 1, 1], [], []>} : vector<2x32xf32>, vector<32x32xf32>, vector<2x32xf32> -> vector<2x32xf32>
    %60 = arith.addf %58, %59 : vector<2x32xf32>
    %61 = arith.negf %60 : vector<2x32xf32>
    %62 = math.exp %61 : vector<2x32xf32>
    %cst_31 = arith.constant 1.000000e+00 : f32
    %63 = vector.broadcast %cst_31 : f32 to vector<2x32xf32>
    %64 = arith.addf %63, %62 : vector<2x32xf32>
    %65 = arith.divf %63, %64 : vector<2x32xf32>
    %66 = arith.index_cast %c1_i32 : i32 to index
    %c0_32 = arith.constant 0 : index
    %c0_33 = arith.constant 0 : index
    %67 = vector.load %arg3[%66, %c0_32, %c0_33] : memref<8x2x32xf32, #tpu.memory_space<vmem>>, vector<1x2x32xf32>
    %68 = vector.shape_cast %67 : vector<1x2x32xf32> to vector<2x32xf32>
    %cst_34 = arith.constant dense<0.000000e+00> : vector<2x32xf32>
    %69 = tpu.matmul %41, %5, %cst_34 {dimension_numbers = #tpu.dot_dimension_numbers<[1], [0], [0], [1], [0, 0, 1, 1], [], []>} : vector<2x32xf32>, vector<32x32xf32>, vector<2x32xf32> -> vector<2x32xf32>
    %70 = vector.broadcast %6 : vector<1x32xf32> to vector<2x32xf32>
    %71 = arith.addf %69, %70 : vector<2x32xf32>
    %72 = arith.mulf %55, %71 : vector<2x32xf32>
    %73 = arith.addf %68, %72 : vector<2x32xf32>
    %74 = math.tanh %73 : vector<2x32xf32>
    %cst_35 = arith.constant 1.000000e+00 : f32
    %75 = vector.broadcast %cst_35 : f32 to vector<2x32xf32>
    %76 = arith.subf %75, %65 : vector<2x32xf32>
    %77 = arith.mulf %76, %74 : vector<2x32xf32>
    %78 = arith.mulf %65, %41 : vector<2x32xf32>
    %79 = arith.addf %77, %78 : vector<2x32xf32>
    %80 = arith.index_cast %c1_i32 : i32 to index
    %c0_36 = arith.constant 0 : index
    %c0_37 = arith.constant 0 : index
    %81 = vector.load %arg8[%80, %c0_36, %c0_37] : memref<8x2x32xf32, #tpu.memory_space<vmem>>, vector<1x2x32xf32>
    %82 = vector.shape_cast %81 : vector<1x2x32xf32> to vector<2x32xf32>
    %83 = vector.shape_cast %79 : vector<2x32xf32> to vector<1x2x32xf32>
    tpu.vector_store %arg8[%80, %c0_36, %c0_37], %83 {strides = array<i32>} : memref<8x2x32xf32, #tpu.memory_space<vmem>>, vector<1x2x32xf32>,
    %c2_i32 = arith.constant 2 : i32
    %84 = arith.index_cast %c2_i32 : i32 to index
    %c0_38 = arith.constant 0 : index
    %c0_39 = arith.constant 0 : index
    %85 = vector.load %arg1[%84, %c0_38, %c0_39] : memref<8x2x32xf32, #tpu.memory_space<vmem>>, vector<1x2x32xf32>
    %86 = vector.shape_cast %85 : vector<1x2x32xf32> to vector<2x32xf32>
    %cst_40 = arith.constant dense<0.000000e+00> : vector<2x32xf32>
    %87 = tpu.matmul %79, %3, %cst_40 {dimension_numbers = #tpu.dot_dimension_numbers<[1], [0], [0], [1], [0, 0, 1, 1], [], []>} : vector<2x32xf32>, vector<32x32xf32>, vector<2x32xf32> -> vector<2x32xf32>
    %88 = arith.addf %86, %87 : vector<2x32xf32>
    %89 = arith.negf %88 : vector<2x32xf32>
    %90 = math.exp %89 : vector<2x32xf32>
    %cst_41 = arith.constant 1.000000e+00 : f32
    %91 = vector.broadcast %cst_41 : f32 to vector<2x32xf32>
    %92 = arith.addf %91, %90 : vector<2x32xf32>
    %93 = arith.divf %91, %92 : vector<2x32xf32>
    %94 = arith.index_cast %c2_i32 : i32 to index
    %c0_42 = arith.constant 0 : index
    %c0_43 = arith.constant 0 : index
    %95 = vector.load %arg2[%94, %c0_42, %c0_43] : memref<8x2x32xf32, #tpu.memory_space<vmem>>, vector<1x2x32xf32>
    %96 = vector.shape_cast %95 : vector<1x2x32xf32> to vector<2x32xf32>
    %cst_44 = arith.constant dense<0.000000e+00> : vector<2x32xf32>
    %97 = tpu.matmul %79, %4, %cst_44 {dimension_numbers = #tpu.dot_dimension_numbers<[1], [0], [0], [1], [0, 0, 1, 1], [], []>} : vector<2x32xf32>, vector<32x32xf32>, vector<2x32xf32> -> vector<2x32xf32>
    %98 = arith.addf %96, %97 : vector<2x32xf32>
    %99 = arith.negf %98 : vector<2x32xf32>
    %100 = math.exp %99 : vector<2x32xf32>
    %cst_45 = arith.constant 1.000000e+00 : f32
    %101 = vector.broadcast %cst_45 : f32 to vector<2x32xf32>
    %102 = arith.addf %101, %100 : vector<2x32xf32>
    %103 = arith.divf %101, %102 : vector<2x32xf32>
    %104 = arith.index_cast %c2_i32 : i32 to index
    %c0_46 = arith.constant 0 : index
    %c0_47 = arith.constant 0 : index
    %105 = vector.load %arg3[%104, %c0_46, %c0_47] : memref<8x2x32xf32, #tpu.memory_space<vmem>>, vector<1x2x32xf32>
    %106 = vector.shape_cast %105 : vector<1x2x32xf32> to vector<2x32xf32>
    %cst_48 = arith.constant dense<0.000000e+00> : vector<2x32xf32>
    %107 = tpu.matmul %79, %5, %cst_48 {dimension_numbers = #tpu.dot_dimension_numbers<[1], [0], [0], [1], [0, 0, 1, 1], [], []>} : vector<2x32xf32>, vector<32x32xf32>, vector<2x32xf32> -> vector<2x32xf32>
    %108 = vector.broadcast %6 : vector<1x32xf32> to vector<2x32xf32>
    %109 = arith.addf %107, %108 : vector<2x32xf32>
    %110 = arith.mulf %93, %109 : vector<2x32xf32>
    %111 = arith.addf %106, %110 : vector<2x32xf32>
    %112 = math.tanh %111 : vector<2x32xf32>
    %cst_49 = arith.constant 1.000000e+00 : f32
    %113 = vector.broadcast %cst_49 : f32 to vector<2x32xf32>
    %114 = arith.subf %113, %103 : vector<2x32xf32>
    %115 = arith.mulf %114, %112 : vector<2x32xf32>
    %116 = arith.mulf %103, %79 : vector<2x32xf32>
    %117 = arith.addf %115, %116 : vector<2x32xf32>
    %118 = arith.index_cast %c2_i32 : i32 to index
    %c0_50 = arith.constant 0 : index
    %c0_51 = arith.constant 0 : index
    %119 = vector.load %arg8[%118, %c0_50, %c0_51] : memref<8x2x32xf32, #tpu.memory_space<vmem>>, vector<1x2x32xf32>
    %120 = vector.shape_cast %119 : vector<1x2x32xf32> to vector<2x32xf32>
    %121 = vector.shape_cast %117 : vector<2x32xf32> to vector<1x2x32xf32>
    tpu.vector_store %arg8[%118, %c0_50, %c0_51], %121 {strides = array<i32>} : memref<8x2x32xf32, #tpu.memory_space<vmem>>, vector<1x2x32xf32>,
    %c3_i32 = arith.constant 3 : i32
    %122 = arith.index_cast %c3_i32 : i32 to index
    %c0_52 = arith.constant 0 : index
    %c0_53 = arith.constant 0 : index
    %123 = vector.load %arg1[%122, %c0_52, %c0_53] : memref<8x2x32xf32, #tpu.memory_space<vmem>>, vector<1x2x32xf32>
    %124 = vector.shape_cast %123 : vector<1x2x32xf32> to vector<2x32xf32>
    %cst_54 = arith.constant dense<0.000000e+00> : vector<2x32xf32>
    %125 = tpu.matmul %117, %3, %cst_54 {dimension_numbers = #tpu.dot_dimension_numbers<[1], [0], [0], [1], [0, 0, 1, 1], [], []>} : vector<2x32xf32>, vector<32x32xf32>, vector<2x32xf32> -> vector<2x32xf32>
    %126 = arith.addf %124, %125 : vector<2x32xf32>
    %127 = arith.negf %126 : vector<2x32xf32>
    %128 = math.exp %127 : vector<2x32xf32>
    %cst_55 = arith.constant 1.000000e+00 : f32
    %129 = vector.broadcast %cst_55 : f32 to vector<2x32xf32>
    %130 = arith.addf %129, %128 : vector<2x32xf32>
    %131 = arith.divf %129, %130 : vector<2x32xf32>
    %132 = arith.index_cast %c3_i32 : i32 to index
    %c0_56 = arith.constant 0 : index
    %c0_57 = arith.constant 0 : index
    %133 = vector.load %arg2[%132, %c0_56, %c0_57] : memref<8x2x32xf32, #tpu.memory_space<vmem>>, vector<1x2x32xf32>
    %134 = vector.shape_cast %133 : vector<1x2x32xf32> to vector<2x32xf32>
    %cst_58 = arith.constant dense<0.000000e+00> : vector<2x32xf32>
    %135 = tpu.matmul %117, %4, %cst_58 {dimension_numbers = #tpu.dot_dimension_numbers<[1], [0], [0], [1], [0, 0, 1, 1], [], []>} : vector<2x32xf32>, vector<32x32xf32>, vector<2x32xf32> -> vector<2x32xf32>
    %136 = arith.addf %134, %135 : vector<2x32xf32>
    %137 = arith.negf %136 : vector<2x32xf32>
    %138 = math.exp %137 : vector<2x32xf32>
    %cst_59 = arith.constant 1.000000e+00 : f32
    %139 = vector.broadcast %cst_59 : f32 to vector<2x32xf32>
    %140 = arith.addf %139, %138 : vector<2x32xf32>
    %141 = arith.divf %139, %140 : vector<2x32xf32>
    %142 = arith.index_cast %c3_i32 : i32 to index
    %c0_60 = arith.constant 0 : index
    %c0_61 = arith.constant 0 : index
    %143 = vector.load %arg3[%142, %c0_60, %c0_61] : memref<8x2x32xf32, #tpu.memory_space<vmem>>, vector<1x2x32xf32>
    %144 = vector.shape_cast %143 : vector<1x2x32xf32> to vector<2x32xf32>
    %cst_62 = arith.constant dense<0.000000e+00> : vector<2x32xf32>
    %145 = tpu.matmul %117, %5, %cst_62 {dimension_numbers = #tpu.dot_dimension_numbers<[1], [0], [0], [1], [0, 0, 1, 1], [], []>} : vector<2x32xf32>, vector<32x32xf32>, vector<2x32xf32> -> vector<2x32xf32>
    %146 = vector.broadcast %6 : vector<1x32xf32> to vector<2x32xf32>
    %147 = arith.addf %145, %146 : vector<2x32xf32>
    %148 = arith.mulf %131, %147 : vector<2x32xf32>
    %149 = arith.addf %144, %148 : vector<2x32xf32>
    %150 = math.tanh %149 : vector<2x32xf32>
    %cst_63 = arith.constant 1.000000e+00 : f32
    %151 = vector.broadcast %cst_63 : f32 to vector<2x32xf32>
    %152 = arith.subf %151, %141 : vector<2x32xf32>
    %153 = arith.mulf %152, %150 : vector<2x32xf32>
    %154 = arith.mulf %141, %117 : vector<2x32xf32>
    %155 = arith.addf %153, %154 : vector<2x32xf32>
    %156 = arith.index_cast %c3_i32 : i32 to index
    %c0_64 = arith.constant 0 : index
    %c0_65 = arith.constant 0 : index
    %157 = vector.load %arg8[%156, %c0_64, %c0_65] : memref<8x2x32xf32, #tpu.memory_space<vmem>>, vector<1x2x32xf32>
    %158 = vector.shape_cast %157 : vector<1x2x32xf32> to vector<2x32xf32>
    %159 = vector.shape_cast %155 : vector<2x32xf32> to vector<1x2x32xf32>
    tpu.vector_store %arg8[%156, %c0_64, %c0_65], %159 {strides = array<i32>} : memref<8x2x32xf32, #tpu.memory_space<vmem>>, vector<1x2x32xf32>,
    %c4_i32 = arith.constant 4 : i32
    %160 = arith.index_cast %c4_i32 : i32 to index
    %c0_66 = arith.constant 0 : index
    %c0_67 = arith.constant 0 : index
    %161 = vector.load %arg1[%160, %c0_66, %c0_67] : memref<8x2x32xf32, #tpu.memory_space<vmem>>, vector<1x2x32xf32>
    %162 = vector.shape_cast %161 : vector<1x2x32xf32> to vector<2x32xf32>
    %cst_68 = arith.constant dense<0.000000e+00> : vector<2x32xf32>
    %163 = tpu.matmul %155, %3, %cst_68 {dimension_numbers = #tpu.dot_dimension_numbers<[1], [0], [0], [1], [0, 0, 1, 1], [], []>} : vector<2x32xf32>, vector<32x32xf32>, vector<2x32xf32> -> vector<2x32xf32>
    %164 = arith.addf %162, %163 : vector<2x32xf32>
    %165 = arith.negf %164 : vector<2x32xf32>
    %166 = math.exp %165 : vector<2x32xf32>
    %cst_69 = arith.constant 1.000000e+00 : f32
    %167 = vector.broadcast %cst_69 : f32 to vector<2x32xf32>
    %168 = arith.addf %167, %166 : vector<2x32xf32>
    %169 = arith.divf %167, %168 : vector<2x32xf32>
    %170 = arith.index_cast %c4_i32 : i32 to index
    %c0_70 = arith.constant 0 : index
    %c0_71 = arith.constant 0 : index
    %171 = vector.load %arg2[%170, %c0_70, %c0_71] : memref<8x2x32xf32, #tpu.memory_space<vmem>>, vector<1x2x32xf32>
    %172 = vector.shape_cast %171 : vector<1x2x32xf32> to vector<2x32xf32>
    %cst_72 = arith.constant dense<0.000000e+00> : vector<2x32xf32>
    %173 = tpu.matmul %155, %4, %cst_72 {dimension_numbers = #tpu.dot_dimension_numbers<[1], [0], [0], [1], [0, 0, 1, 1], [], []>} : vector<2x32xf32>, vector<32x32xf32>, vector<2x32xf32> -> vector<2x32xf32>
    %174 = arith.addf %172, %173 : vector<2x32xf32>
    %175 = arith.negf %174 : vector<2x32xf32>
    %176 = math.exp %175 : vector<2x32xf32>
    %cst_73 = arith.constant 1.000000e+00 : f32
    %177 = vector.broadcast %cst_73 : f32 to vector<2x32xf32>
    %178 = arith.addf %177, %176 : vector<2x32xf32>
    %179 = arith.divf %177, %178 : vector<2x32xf32>
    %180 = arith.index_cast %c4_i32 : i32 to index
    %c0_74 = arith.constant 0 : index
    %c0_75 = arith.constant 0 : index
    %181 = vector.load %arg3[%180, %c0_74, %c0_75] : memref<8x2x32xf32, #tpu.memory_space<vmem>>, vector<1x2x32xf32>
    %182 = vector.shape_cast %181 : vector<1x2x32xf32> to vector<2x32xf32>
    %cst_76 = arith.constant dense<0.000000e+00> : vector<2x32xf32>
    %183 = tpu.matmul %155, %5, %cst_76 {dimension_numbers = #tpu.dot_dimension_numbers<[1], [0], [0], [1], [0, 0, 1, 1], [], []>} : vector<2x32xf32>, vector<32x32xf32>, vector<2x32xf32> -> vector<2x32xf32>
    %184 = vector.broadcast %6 : vector<1x32xf32> to vector<2x32xf32>
    %185 = arith.addf %183, %184 : vector<2x32xf32>
    %186 = arith.mulf %169, %185 : vector<2x32xf32>
    %187 = arith.addf %182, %186 : vector<2x32xf32>
    %188 = math.tanh %187 : vector<2x32xf32>
    %cst_77 = arith.constant 1.000000e+00 : f32
    %189 = vector.broadcast %cst_77 : f32 to vector<2x32xf32>
    %190 = arith.subf %189, %179 : vector<2x32xf32>
    %191 = arith.mulf %190, %188 : vector<2x32xf32>
    %192 = arith.mulf %179, %155 : vector<2x32xf32>
    %193 = arith.addf %191, %192 : vector<2x32xf32>
    %194 = arith.index_cast %c4_i32 : i32 to index
    %c0_78 = arith.constant 0 : index
    %c0_79 = arith.constant 0 : index
    %195 = vector.load %arg8[%194, %c0_78, %c0_79] : memref<8x2x32xf32, #tpu.memory_space<vmem>>, vector<1x2x32xf32>
    %196 = vector.shape_cast %195 : vector<1x2x32xf32> to vector<2x32xf32>
    %197 = vector.shape_cast %193 : vector<2x32xf32> to vector<1x2x32xf32>
    tpu.vector_store %arg8[%194, %c0_78, %c0_79], %197 {strides = array<i32>} : memref<8x2x32xf32, #tpu.memory_space<vmem>>, vector<1x2x32xf32>,
    %c5_i32 = arith.constant 5 : i32
    %198 = arith.index_cast %c5_i32 : i32 to index
    %c0_80 = arith.constant 0 : index
    %c0_81 = arith.constant 0 : index
    %199 = vector.load %arg1[%198, %c0_80, %c0_81] : memref<8x2x32xf32, #tpu.memory_space<vmem>>, vector<1x2x32xf32>
    %200 = vector.shape_cast %199 : vector<1x2x32xf32> to vector<2x32xf32>
    %cst_82 = arith.constant dense<0.000000e+00> : vector<2x32xf32>
    %201 = tpu.matmul %193, %3, %cst_82 {dimension_numbers = #tpu.dot_dimension_numbers<[1], [0], [0], [1], [0, 0, 1, 1], [], []>} : vector<2x32xf32>, vector<32x32xf32>, vector<2x32xf32> -> vector<2x32xf32>
    %202 = arith.addf %200, %201 : vector<2x32xf32>
    %203 = arith.negf %202 : vector<2x32xf32>
    %204 = math.exp %203 : vector<2x32xf32>
    %cst_83 = arith.constant 1.000000e+00 : f32
    %205 = vector.broadcast %cst_83 : f32 to vector<2x32xf32>
    %206 = arith.addf %205, %204 : vector<2x32xf32>
    %207 = arith.divf %205, %206 : vector<2x32xf32>
    %208 = arith.index_cast %c5_i32 : i32 to index
    %c0_84 = arith.constant 0 : index
    %c0_85 = arith.constant 0 : index
    %209 = vector.load %arg2[%208, %c0_84, %c0_85] : memref<8x2x32xf32, #tpu.memory_space<vmem>>, vector<1x2x32xf32>
    %210 = vector.shape_cast %209 : vector<1x2x32xf32> to vector<2x32xf32>
    %cst_86 = arith.constant dense<0.000000e+00> : vector<2x32xf32>
    %211 = tpu.matmul %193, %4, %cst_86 {dimension_numbers = #tpu.dot_dimension_numbers<[1], [0], [0], [1], [0, 0, 1, 1], [], []>} : vector<2x32xf32>, vector<32x32xf32>, vector<2x32xf32> -> vector<2x32xf32>
    %212 = arith.addf %210, %211 : vector<2x32xf32>
    %213 = arith.negf %212 : vector<2x32xf32>
    %214 = math.exp %213 : vector<2x32xf32>
    %cst_87 = arith.constant 1.000000e+00 : f32
    %215 = vector.broadcast %cst_87 : f32 to vector<2x32xf32>
    %216 = arith.addf %215, %214 : vector<2x32xf32>
    %217 = arith.divf %215, %216 : vector<2x32xf32>
    %218 = arith.index_cast %c5_i32 : i32 to index
    %c0_88 = arith.constant 0 : index
    %c0_89 = arith.constant 0 : index
    %219 = vector.load %arg3[%218, %c0_88, %c0_89] : memref<8x2x32xf32, #tpu.memory_space<vmem>>, vector<1x2x32xf32>
    %220 = vector.shape_cast %219 : vector<1x2x32xf32> to vector<2x32xf32>
    %cst_90 = arith.constant dense<0.000000e+00> : vector<2x32xf32>
    %221 = tpu.matmul %193, %5, %cst_90 {dimension_numbers = #tpu.dot_dimension_numbers<[1], [0], [0], [1], [0, 0, 1, 1], [], []>} : vector<2x32xf32>, vector<32x32xf32>, vector<2x32xf32> -> vector<2x32xf32>
    %222 = vector.broadcast %6 : vector<1x32xf32> to vector<2x32xf32>
    %223 = arith.addf %221, %222 : vector<2x32xf32>
    %224 = arith.mulf %207, %223 : vector<2x32xf32>
    %225 = arith.addf %220, %224 : vector<2x32xf32>
    %226 = math.tanh %225 : vector<2x32xf32>
    %cst_91 = arith.constant 1.000000e+00 : f32
    %227 = vector.broadcast %cst_91 : f32 to vector<2x32xf32>
    %228 = arith.subf %227, %217 : vector<2x32xf32>
    %229 = arith.mulf %228, %226 : vector<2x32xf32>
    %230 = arith.mulf %217, %193 : vector<2x32xf32>
    %231 = arith.addf %229, %230 : vector<2x32xf32>
    %232 = arith.index_cast %c5_i32 : i32 to index
    %c0_92 = arith.constant 0 : index
    %c0_93 = arith.constant 0 : index
    %233 = vector.load %arg8[%232, %c0_92, %c0_93] : memref<8x2x32xf32, #tpu.memory_space<vmem>>, vector<1x2x32xf32>
    %234 = vector.shape_cast %233 : vector<1x2x32xf32> to vector<2x32xf32>
    %235 = vector.shape_cast %231 : vector<2x32xf32> to vector<1x2x32xf32>
    tpu.vector_store %arg8[%232, %c0_92, %c0_93], %235 {strides = array<i32>} : memref<8x2x32xf32, #tpu.memory_space<vmem>>, vector<1x2x32xf32>,
    %c6_i32 = arith.constant 6 : i32
    %236 = arith.index_cast %c6_i32 : i32 to index
    %c0_94 = arith.constant 0 : index
    %c0_95 = arith.constant 0 : index
    %237 = vector.load %arg1[%236, %c0_94, %c0_95] : memref<8x2x32xf32, #tpu.memory_space<vmem>>, vector<1x2x32xf32>
    %238 = vector.shape_cast %237 : vector<1x2x32xf32> to vector<2x32xf32>
    %cst_96 = arith.constant dense<0.000000e+00> : vector<2x32xf32>
    %239 = tpu.matmul %231, %3, %cst_96 {dimension_numbers = #tpu.dot_dimension_numbers<[1], [0], [0], [1], [0, 0, 1, 1], [], []>} : vector<2x32xf32>, vector<32x32xf32>, vector<2x32xf32> -> vector<2x32xf32>
    %240 = arith.addf %238, %239 : vector<2x32xf32>
    %241 = arith.negf %240 : vector<2x32xf32>
    %242 = math.exp %241 : vector<2x32xf32>
    %cst_97 = arith.constant 1.000000e+00 : f32
    %243 = vector.broadcast %cst_97 : f32 to vector<2x32xf32>
    %244 = arith.addf %243, %242 : vector<2x32xf32>
    %245 = arith.divf %243, %244 : vector<2x32xf32>
    %246 = arith.index_cast %c6_i32 : i32 to index
    %c0_98 = arith.constant 0 : index
    %c0_99 = arith.constant 0 : index
    %247 = vector.load %arg2[%246, %c0_98, %c0_99] : memref<8x2x32xf32, #tpu.memory_space<vmem>>, vector<1x2x32xf32>
    %248 = vector.shape_cast %247 : vector<1x2x32xf32> to vector<2x32xf32>
    %cst_100 = arith.constant dense<0.000000e+00> : vector<2x32xf32>
    %249 = tpu.matmul %231, %4, %cst_100 {dimension_numbers = #tpu.dot_dimension_numbers<[1], [0], [0], [1], [0, 0, 1, 1], [], []>} : vector<2x32xf32>, vector<32x32xf32>, vector<2x32xf32> -> vector<2x32xf32>
    %250 = arith.addf %248, %249 : vector<2x32xf32>
    %251 = arith.negf %250 : vector<2x32xf32>
    %252 = math.exp %251 : vector<2x32xf32>
    %cst_101 = arith.constant 1.000000e+00 : f32
    %253 = vector.broadcast %cst_101 : f32 to vector<2x32xf32>
    %254 = arith.addf %253, %252 : vector<2x32xf32>
    %255 = arith.divf %253, %254 : vector<2x32xf32>
    %256 = arith.index_cast %c6_i32 : i32 to index
    %c0_102 = arith.constant 0 : index
    %c0_103 = arith.constant 0 : index
    %257 = vector.load %arg3[%256, %c0_102, %c0_103] : memref<8x2x32xf32, #tpu.memory_space<vmem>>, vector<1x2x32xf32>
    %258 = vector.shape_cast %257 : vector<1x2x32xf32> to vector<2x32xf32>
    %cst_104 = arith.constant dense<0.000000e+00> : vector<2x32xf32>
    %259 = tpu.matmul %231, %5, %cst_104 {dimension_numbers = #tpu.dot_dimension_numbers<[1], [0], [0], [1], [0, 0, 1, 1], [], []>} : vector<2x32xf32>, vector<32x32xf32>, vector<2x32xf32> -> vector<2x32xf32>
    %260 = vector.broadcast %6 : vector<1x32xf32> to vector<2x32xf32>
    %261 = arith.addf %259, %260 : vector<2x32xf32>
    %262 = arith.mulf %245, %261 : vector<2x32xf32>
    %263 = arith.addf %258, %262 : vector<2x32xf32>
    %264 = math.tanh %263 : vector<2x32xf32>
    %cst_105 = arith.constant 1.000000e+00 : f32
    %265 = vector.broadcast %cst_105 : f32 to vector<2x32xf32>
    %266 = arith.subf %265, %255 : vector<2x32xf32>
    %267 = arith.mulf %266, %264 : vector<2x32xf32>
    %268 = arith.mulf %255, %231 : vector<2x32xf32>
    %269 = arith.addf %267, %268 : vector<2x32xf32>
    %270 = arith.index_cast %c6_i32 : i32 to index
    %c0_106 = arith.constant 0 : index
    %c0_107 = arith.constant 0 : index
    %271 = vector.load %arg8[%270, %c0_106, %c0_107] : memref<8x2x32xf32, #tpu.memory_space<vmem>>, vector<1x2x32xf32>
    %272 = vector.shape_cast %271 : vector<1x2x32xf32> to vector<2x32xf32>
    %273 = vector.shape_cast %269 : vector<2x32xf32> to vector<1x2x32xf32>
    tpu.vector_store %arg8[%270, %c0_106, %c0_107], %273 {strides = array<i32>} : memref<8x2x32xf32, #tpu.memory_space<vmem>>, vector<1x2x32xf32>,
    %c7_i32 = arith.constant 7 : i32
    %274 = arith.index_cast %c7_i32 : i32 to index
    %c0_108 = arith.constant 0 : index
    %c0_109 = arith.constant 0 : index
    %275 = vector.load %arg1[%274, %c0_108, %c0_109] : memref<8x2x32xf32, #tpu.memory_space<vmem>>, vector<1x2x32xf32>
    %276 = vector.shape_cast %275 : vector<1x2x32xf32> to vector<2x32xf32>
    %cst_110 = arith.constant dense<0.000000e+00> : vector<2x32xf32>
    %277 = tpu.matmul %269, %3, %cst_110 {dimension_numbers = #tpu.dot_dimension_numbers<[1], [0], [0], [1], [0, 0, 1, 1], [], []>} : vector<2x32xf32>, vector<32x32xf32>, vector<2x32xf32> -> vector<2x32xf32>
    %278 = arith.addf %276, %277 : vector<2x32xf32>
    %279 = arith.negf %278 : vector<2x32xf32>
    %280 = math.exp %279 : vector<2x32xf32>
    %cst_111 = arith.constant 1.000000e+00 : f32
    %281 = vector.broadcast %cst_111 : f32 to vector<2x32xf32>
    %282 = arith.addf %281, %280 : vector<2x32xf32>
    %283 = arith.divf %281, %282 : vector<2x32xf32>
    %284 = arith.index_cast %c7_i32 : i32 to index
    %c0_112 = arith.constant 0 : index
    %c0_113 = arith.constant 0 : index
    %285 = vector.load %arg2[%284, %c0_112, %c0_113] : memref<8x2x32xf32, #tpu.memory_space<vmem>>, vector<1x2x32xf32>
    %286 = vector.shape_cast %285 : vector<1x2x32xf32> to vector<2x32xf32>
    %cst_114 = arith.constant dense<0.000000e+00> : vector<2x32xf32>
    %287 = tpu.matmul %269, %4, %cst_114 {dimension_numbers = #tpu.dot_dimension_numbers<[1], [0], [0], [1], [0, 0, 1, 1], [], []>} : vector<2x32xf32>, vector<32x32xf32>, vector<2x32xf32> -> vector<2x32xf32>
    %288 = arith.addf %286, %287 : vector<2x32xf32>
    %289 = arith.negf %288 : vector<2x32xf32>
    %290 = math.exp %289 : vector<2x32xf32>
    %cst_115 = arith.constant 1.000000e+00 : f32
    %291 = vector.broadcast %cst_115 : f32 to vector<2x32xf32>
    %292 = arith.addf %291, %290 : vector<2x32xf32>
    %293 = arith.divf %291, %292 : vector<2x32xf32>
    %294 = arith.index_cast %c7_i32 : i32 to index
    %c0_116 = arith.constant 0 : index
    %c0_117 = arith.constant 0 : index
    %295 = vector.load %arg3[%294, %c0_116, %c0_117] : memref<8x2x32xf32, #tpu.memory_space<vmem>>, vector<1x2x32xf32>
    %296 = vector.shape_cast %295 : vector<1x2x32xf32> to vector<2x32xf32>
    %cst_118 = arith.constant dense<0.000000e+00> : vector<2x32xf32>
    %297 = tpu.matmul %269, %5, %cst_118 {dimension_numbers = #tpu.dot_dimension_numbers<[1], [0], [0], [1], [0, 0, 1, 1], [], []>} : vector<2x32xf32>, vector<32x32xf32>, vector<2x32xf32> -> vector<2x32xf32>
    %298 = vector.broadcast %6 : vector<1x32xf32> to vector<2x32xf32>
    %299 = arith.addf %297, %298 : vector<2x32xf32>
    %300 = arith.mulf %283, %299 : vector<2x32xf32>
    %301 = arith.addf %296, %300 : vector<2x32xf32>
    %302 = math.tanh %301 : vector<2x32xf32>
    %cst_119 = arith.constant 1.000000e+00 : f32
    %303 = vector.broadcast %cst_119 : f32 to vector<2x32xf32>
    %304 = arith.subf %303, %293 : vector<2x32xf32>
    %305 = arith.mulf %304, %302 : vector<2x32xf32>
    %306 = arith.mulf %293, %269 : vector<2x32xf32>
    %307 = arith.addf %305, %306 : vector<2x32xf32>
    %308 = arith.index_cast %c7_i32 : i32 to index
    %c0_120 = arith.constant 0 : index
    %c0_121 = arith.constant 0 : index
    %309 = vector.load %arg8[%308, %c0_120, %c0_121] : memref<8x2x32xf32, #tpu.memory_space<vmem>>, vector<1x2x32xf32>
    %310 = vector.shape_cast %309 : vector<1x2x32xf32> to vector<2x32xf32>
    %311 = vector.shape_cast %307 : vector<2x32xf32> to vector<1x2x32xf32>
    tpu.vector_store %arg8[%308, %c0_120, %c0_121], %311 {strides = array<i32>} : memref<8x2x32xf32, #tpu.memory_space<vmem>>, vector<1x2x32xf32>,
    %c8_i32 = arith.constant 8 : i32
    %c0_122 = arith.constant 0 : index
    %c0_123 = arith.constant 0 : index
    %312 = vector.load %arg9[%c0_122, %c0_123] : memref<2x32xf32, #tpu.memory_space<vmem>>, vector<2x32xf32>
    tpu.vector_store %arg9[%c0_122, %c0_123], %307 {strides = array<i32>} : memref<2x32xf32, #tpu.memory_space<vmem>>, vector<2x32xf32>,
    return
  }
  func.func @transform_0(%arg0: i32) -> (i32, i32, i32) {
    %c0_i32 = arith.constant 0 : i32
    %c0_i32_0 = arith.constant 0 : i32
    %c0_i32_1 = arith.constant 0 : i32
    return %arg0, %c0_i32, %c0_i32_0 : i32, i32, i32
  }
  func.func @transform_1(%arg0: i32) -> (i32, i32, i32) {
    %c0_i32 = arith.constant 0 : i32
    %c0_i32_0 = arith.constant 0 : i32
    %c0_i32_1 = arith.constant 0 : i32
    return %arg0, %c0_i32, %c0_i32_0 : i32, i32, i32
  }
  func.func @transform_2(%arg0: i32) -> (i32, i32, i32) {
    %c0_i32 = arith.constant 0 : i32
    %c0_i32_0 = arith.constant 0 : i32
    %c0_i32_1 = arith.constant 0 : i32
    return %arg0, %c0_i32, %c0_i32_0 : i32, i32, i32
  }
  func.func @transform_3(%arg0: i32) -> (i32, i32) {
    %c0_i32 = arith.constant 0 : i32
    %c0_i32_0 = arith.constant 0 : i32
    %c0_i32_1 = arith.constant 0 : i32
    return %c0_i32, %c0_i32_0 : i32, i32
  }
  func.func @transform_4(%arg0: i32) -> (i32, i32) {
    %c0_i32 = arith.constant 0 : i32
    %c0_i32_0 = arith.constant 0 : i32
    %c0_i32_1 = arith.constant 0 : i32
    return %c0_i32, %c0_i32_0 : i32, i32
  }
  func.func @transform_5(%arg0: i32) -> (i32, i32) {
    %c0_i32 = arith.constant 0 : i32
    %c0_i32_0 = arith.constant 0 : i32
    %c0_i32_1 = arith.constant 0 : i32
    return %c0_i32, %c0_i32_0 : i32, i32
  }
  func.func @transform_6(%arg0: i32) -> (i32, i32) {
    %c0_i32 = arith.constant 0 : i32
    %c0_i32_0 = arith.constant 0 : i32
    %c0_i32_1 = arith.constant 0 : i32
    return %c0_i32, %c0_i32_0 : i32, i32
  }
  func.func @transform_7(%arg0: i32) -> (i32, i32, i32) {
    %c0_i32 = arith.constant 0 : i32
    %c0_i32_0 = arith.constant 0 : i32
    %c0_i32_1 = arith.constant 0 : i32
    return %arg0, %c0_i32, %c0_i32_0 : i32, i32, i32
  }
}

</mosaic_0001>

<bundles_post_ra>
// kernel: tpu_custom_call.1
= control target key start
LH: loop header
LB: loop body
LE: loop exit
PB: predicated region body
PF: predicated region fallthrough
CT: control target
= control target key end

     0   :  { %12 = vsyncpa [#allocation4], 0  ;;  %s3301_s0 = inlined_call_operand.hbm [shape: f32[8,2,32], index: 0, kind: input, shape index: {}]   ;;  %s3302_s1 = inlined_call_operand.hbm [shape: f32[8,2,32], index: 1, kind: input, shape index: {}]   ;;  %s3303_s2 = inlined_call_operand.hbm [shape: f32[8,2,32], index: 2, kind: input, shape index: {}]   ;;  %s3304_s3 = inlined_call_operand.hbm [shape: f32[32,32], index: 3, kind: input, shape index: {}]   ;;  %s3305_s4 = inlined_call_operand.hbm [shape: f32[32,32], index: 4, kind: input, shape index: {}]   ;;  %s3306_s5 = inlined_call_operand.hbm [shape: f32[32,32], index: 5, kind: input, shape index: {}]   ;;  %s3307_s6 = inlined_call_operand.vmem [shape: f32[1,32], index: 6, kind: input, shape index: {}]   ;;  %s3308_s7 = inlined_call_operand.hbm [shape: f32[8,2,32], index: 7, kind: output, shape index: {}]  }
   0x1   :  { %13 = vsyncpa [#allocation7], 0 }
   0x2   :  { %14 = vsyncpa [#allocation10], 0 }
   0x3   :  { %15 = vsyncpa [#allocation13], 0 }
   0x4   :  { %16 = vsyncpa [#allocation5], 0  ;;  %s2917_s24 = smov [#allocation6]   ;;  %s2918_s26 = smov [#allocation9]  }
   0x5   :  { %s34_s25 = sshll.u32 %s2917_s24, 4  ;;  %s58_s27 = sshll.u32 %s2918_s26, 4  ;;  %s35_s25 = int_to_ptr.vmem [resolvable:$true] %s34_s25  ;;  %s2971_s27 = int_to_ptr.vmem [resolvable:$true] %s58_s27 }
   0x6   :  { %s2753_s30 = scalar_lea.hbm %s3302_s1, 256 }
   0x7   :  { %p2754_p0 = scmp.ne.s32.totalorder %s3302_s1, %s2753_s30  ;;  %p2757_p1 = scmp.lt.u32.totalorder %s2753_s30, %s3302_s1 }
   0x9   :  { %p2759_p2 = pnand %p2757_p1, %p2754_p0 }
   0xb   :  { %2762 = shalt.err (!%p2759_p2)
}
   0xc   :  { %s2763_s12 = scalar_lea.vmem %s35_s25, 256  ;;  %p2768_p4 = scmp.lt.s32.totalorder %s35_s25, %s35_s25 }
   0xd   :  { %p2764_p3 = scmp.ne.s32.totalorder %s35_s25, %s2763_s12  ;;  %p2769_p5 = scmp.lt.s32.totalorder %s2763_s12, %s2763_s12 }
   0xf   :  { %p2770_p6 = por %p2769_p5, %p2768_p4 }
  0x11   :  { %p2771_p7 = pnand %p2770_p6, %p2764_p3 }
  0x13   :  { %2774 = shalt.err (!%p2771_p7)
}
  0x14   :  { %s2919_s13 = smov 32   ;;  %s2920_s14 = smov 2  }
  0x15   :  { %40 = dma.hbm_to_vmem [thread:$0]  %s3302_s1, 256, %s35_s25, [#allocation7], %s2919_s13, %s2919_s13, %s2920_s14  }
  0x16   :  { %s2775_s19 = scalar_lea.hbm %s3304_s3, 512 }
  0x17   :  { %p2776_p8 = scmp.ne.s32.totalorder %s3304_s3, %s2775_s19  ;;  %p2779_p9 = scmp.lt.u32.totalorder %s2775_s19, %s3304_s3 }
  0x19   :  { %p2781_p10 = pnand %p2779_p9, %p2776_p8 }
  0x1b   :  { %2784 = shalt.err (!%p2781_p10)
}
  0x1c   :  { %s2785_s24 = scalar_lea.vmem %s2971_s27, 512  ;;  %p2790_p12 = scmp.lt.s32.totalorder %s2971_s27, %s2971_s27 }
  0x1d   :  { %p2786_p11 = scmp.ne.s32.totalorder %s2971_s27, %s2785_s24  ;;  %p2791_p13 = scmp.lt.s32.totalorder %s2785_s24, %s2785_s24 }
  0x1f   :  { %p2792_p0 = por %p2791_p13, %p2790_p12 }
  0x21   :  { %p2793_p1 = pnand %p2792_p0, %p2786_p11 }
  0x23   :  { %2796 = shalt.err (!%p2793_p1)
}
  0x24   :  { %s2921_s1 = smov 128   ;;  %s2922_s25 = smov 8  }
  0x25   :  { %64 = dma.hbm_to_vmem [thread:$0]  %s3304_s3, 512, %s2971_s27, [#allocation10], %s2921_s1, %s2921_s1, %s2922_s25  }
  0x26   :  { %s2923_s29 = smov [#allocation3]   ;;  %s2924_s8 = smov [#allocation8]  }
  0x27   :  { %s22_s30 = sshll.u32 %s2923_s29, 4  ;;  %s46_s9 = sshll.u32 %s2924_s8, 4  ;;  %s23_s30 = int_to_ptr.vmem [resolvable:$true] %s22_s30  ;;  %s3008_s9 = int_to_ptr.vmem [resolvable:$true] %s46_s9 }
  0x28   :  { %s2797_s12 = scalar_lea.hbm %s3301_s0, 256 }
  0x29   :  { %p2798_p2 = scmp.ne.s32.totalorder %s3301_s0, %s2797_s12  ;;  %p2801_p3 = scmp.lt.u32.totalorder %s2797_s12, %s3301_s0 }
  0x2b   :  { %p2803_p4 = pnand %p2801_p3, %p2798_p2 }
  0x2d   :  { %2806 = shalt.err (!%p2803_p4)
}
  0x2e   :  { %s2807_s3 = scalar_lea.vmem %s23_s30, 256  ;;  %p2812_p6 = scmp.lt.s32.totalorder %s23_s30, %s23_s30 }
  0x2f   :  { %p2808_p5 = scmp.ne.s32.totalorder %s23_s30, %s2807_s3  ;;  %p2813_p7 = scmp.lt.s32.totalorder %s2807_s3, %s2807_s3 }
  0x31   :  { %p2814_p8 = por %p2813_p7, %p2812_p6 }
  0x33   :  { %p2815_p9 = pnand %p2814_p8, %p2808_p5 }
  0x35   :  { %2818 = shalt.err (!%p2815_p9)
}
  0x36   :  { %28 = dma.hbm_to_vmem [thread:$0]  %s3301_s0, 256, %s23_s30, [#allocation4], %s2919_s13, %s2919_s13, %s2920_s14  }
  0x37   :  { %s2819_s22 = scalar_lea.hbm %s3303_s2, 256 }
  0x38   :  { %p2820_p10 = scmp.ne.s32.totalorder %s3303_s2, %s2819_s22  ;;  %p2823_p11 = scmp.lt.u32.totalorder %s2819_s22, %s3303_s2 }
  0x3a   :  { %p2825_p12 = pnand %p2823_p11, %p2820_p10 }
  0x3c   :  { %2828 = shalt.err (!%p2825_p12)
}
  0x3d   :  { %s2829_s29 = scalar_lea.vmem %s3008_s9, 256  ;;  %p2834_p0 = scmp.lt.s32.totalorder %s3008_s9, %s3008_s9 }
  0x3e   :  { %p2830_p13 = scmp.ne.s32.totalorder %s3008_s9, %s2829_s29  ;;  %p2835_p1 = scmp.lt.s32.totalorder %s2829_s29, %s2829_s29 }
  0x40   :  { %p2836_p2 = por %p2835_p1, %p2834_p0 }
  0x42   :  { %p2837_p3 = pnand %p2836_p2, %p2830_p13 }
  0x44   :  { %2840 = shalt.err (!%p2837_p3)
}
  0x45   :  { %52 = dma.hbm_to_vmem [thread:$0]  %s3303_s2, 256, %s3008_s9, [#allocation7], %s2919_s13, %s2919_s13, %s2920_s14  }
  0x46   :  { %s2925_s8 = smov [#allocation11]   ;;  %s2926_s11 = smov [#allocation12]  }
  0x47   :  { %s70_s10 = sshll.u32 %s2925_s8, 4  ;;  %s82_s12 = sshll.u32 %s2926_s11, 4  ;;  %s71_s10 = int_to_ptr.vmem [resolvable:$true] %s70_s10  ;;  %s3045_s12 = int_to_ptr.vmem [resolvable:$true] %s82_s12 }
  0x48   :  { %s2841_s17 = scalar_lea.hbm %s3305_s4, 512 }
  0x49   :  { %p2842_p4 = scmp.ne.s32.totalorder %s3305_s4, %s2841_s17  ;;  %p2845_p5 = scmp.lt.u32.totalorder %s2841_s17, %s3305_s4 }
  0x4b   :  { %p2847_p6 = pnand %p2845_p5, %p2842_p4 }
  0x4d   :  { %2850 = shalt.err (!%p2847_p6)
}
  0x4e   :  { %s2851_s2 = scalar_lea.vmem %s71_s10, 512  ;;  %p2856_p8 = scmp.lt.s32.totalorder %s71_s10, %s71_s10 }
  0x4f   :  { %p2852_p7 = scmp.ne.s32.totalorder %s71_s10, %s2851_s2  ;;  %p2857_p9 = scmp.lt.s32.totalorder %s2851_s2, %s2851_s2 }
  0x51   :  { %p2858_p10 = por %p2857_p9, %p2856_p8 }
  0x53   :  { %p2859_p11 = pnand %p2858_p10, %p2852_p7 }
  0x55   :  { %2862 = shalt.err (!%p2859_p11)
}
  0x56   :  { %76 = dma.hbm_to_vmem [thread:$0]  %s3305_s4, 512, %s71_s10, [#allocation10], %s2921_s1, %s2921_s1, %s2922_s25  }
  0x57   :  { %s2863_s23 = scalar_lea.hbm %s3306_s5, 512 }
  0x58   :  { %p2864_p12 = scmp.ne.s32.totalorder %s3306_s5, %s2863_s23  ;;  %p2867_p13 = scmp.lt.u32.totalorder %s2863_s23, %s3306_s5 }
  0x5a   :  { %p2869_p0 = pnand %p2867_p13, %p2864_p12 }
  0x5c   :  { %2872 = shalt.err (!%p2869_p0)
}
  0x5d   :  { %s2873_s0 = scalar_lea.vmem %s3045_s12, 512  ;;  %p2878_p2 = scmp.lt.s32.totalorder %s3045_s12, %s3045_s12 }
  0x5e   :  { %p2874_p1 = scmp.ne.s32.totalorder %s3045_s12, %s2873_s0  ;;  %p2879_p3 = scmp.lt.s32.totalorder %s2873_s0, %s2873_s0 }
  0x60   :  { %p2880_p4 = por %p2879_p3, %p2878_p2 }
  0x62   :  { %p2881_p5 = pnand %p2880_p4, %p2874_p1 }
  0x64   :  { %2884 = shalt.err (!%p2881_p5)
}
  0x65   :  { %88 = dma.hbm_to_vmem [thread:$0]  %s3306_s5, 512, %s3045_s12, [#allocation13], %s2921_s1, %s2921_s1, %s2922_s25  }
  0x66   :  { %2907 = dma.done.wait [#allocation4], 256  }
  0x67   :  { %2908 = vsyncadd [#allocation4], 4294967040 }
  0x68   :  { %2909 = dma.done.wait [#allocation7], 512  }
  0x69   :  { %2910 = vsyncadd [#allocation7], 4294966784 }
  0x6a   :  { %2911 = dma.done.wait [#allocation10], 1024  }
  0x6b   :  { %2912 = vsyncadd [#allocation10], 4294966272 }
  0x6c   :  { %2913 = dma.done.wait [#allocation13], 512  }
  0x6d   :  { %2914 = vsyncadd [#allocation13], 4294966784  ;;  %vm113_vm0 = vcmask 254976   ;;  %v2927_v0 = vmov 0.0|0.0   ;;  %vm2928_vm1 = vmmov 0   ;;  %v2929_v1 = vmov 0.0  }
  0x6e   :  { %2515 = vmatprep.subr.bf16.mxu0 %v2927_v0  ;;  %2259 = vmatprep.mubr.msk.f32.mxu0 %vm2928_vm1, %v2929_v1  ;;  %114 = vst.msk [vmem:[#allocation2] sm:$0x3] %vm113_vm0, %v2929_v1  ;;  %v115_v2 = vld [vmem:[#allocation9] sm:$0xff]  ;;  %v116_v3 = vld [vmem:[#allocation9 + $0x8] sm:$0xff]  ;;  %v117_v4 = vld [vmem:[#allocation9 + $0x10] sm:$0xff]  ;;  %vm130_vm2 = vcmask 261120  }
  0x6f   :  { %2521 = vmatprep.subr.bf16.mxu1 %v2927_v0  ;;  %2270 = vmatprep.mubr.msk.f32.mxu1 %vm2928_vm1, %v2929_v1  ;;  %v3090_v5 = vpack.c.bf16 %v116_v3, %v115_v2  ;;  %v118_v6 = vld [vmem:[#allocation9 + $0x18] sm:$0xff]  ;;  %v119_v7 = vld [vmem:[#allocation11] sm:$0xff]  ;;  %v120_v8 = vld [vmem:[#allocation11 + $0x8] sm:$0xff] }
  0x70   :  { %v121_v9 = vld [vmem:[#allocation11 + $0x10] sm:$0xff]  ;;  %v122_v10 = vld [vmem:[#allocation11 + $0x18] sm:$0xff]  ;;  %v3093_v11 = vpack.c.bf16 %v118_v6, %v117_v4  ;;  %v3095_v12 = vpack.c.bf16 %v120_v8, %v119_v7  ;;  %v123_v13 = vld [vmem:[#allocation12] sm:$0xff] }
  0x71   :  { %2517 = vmatpush3.bf16.msra.mxu0 %v3090_v5  ;;  %v124_v14 = vld [vmem:[#allocation12 + $0x8] sm:$0xff]  ;;  %v3099_v15 = vpack.c.bf16 %v122_v10, %v121_v9  ;;  %v125_v18 = vld [vmem:[#allocation12 + $0x10] sm:$0xff]  ;;  %v126_v19 = vld [vmem:[#allocation12 + $0x18] sm:$0xff] }
  0x72   :  { %2518 = vmatprep.subr.bf16.mxu0 %v2927_v0  ;;  %2523 = vmatpush3.bf16.msra.mxu1 %v3095_v12  ;;  %v3103_v17 = vpack.c.bf16 %v124_v14, %v123_v13  ;;  %v3110_v20 = vpack.c.bf16 %v126_v19, %v125_v18  ;;  %v129_v21 = vld [vmem:[#allocation3] sm:$0x3]  ;;  %v211_v23 = vld [vmem:[#allocation6] sm:$0x3]  ;;  %v3134_v36 = vld [vmem:[%s3307_s6] ss:$0 sm:$0xff] }
  0x73   :  { %2524 = vmatprep.subr.bf16.mxu1 %v2927_v0  ;;  %v289_v40 = vld [vmem:[#allocation8] sm:$0x3]  ;;  %v376_v49 = vld [vmem:[#allocation3 + $0x2] sm:$0x3]  ;;  %v458_v53 = vld [vmem:[#allocation6 + $0x2] sm:$0x3] }
  0x74   :  { %v537_v6 = vld [vmem:[#allocation8 + $0x2] sm:$0x3]  ;;  %v618_v19 = vld [vmem:[#allocation3 + $0x4] sm:$0x3]  ;;  %s2930_s6 = smov [#allocation14]  }
  0x75   :  { %2520 = vmatpush3.bf16.msra.mxu0 %v3093_v11  ;;  %v128_v16 = vld [vmem:[#allocation2] sm:$0x3]  ;;  %s2075_s25 = sshll.u32 %s2930_s6, 4  ;;  %s2076_s25 = int_to_ptr.vmem [resolvable:$true] %s2075_s25 }
  0x76   :  { %2527 = vmatprep.subr.bf16.mxu0 %v2927_v0  ;;  %2526 = vmatpush3.bf16.msra.mxu1 %v3099_v15  ;;  %s2885_s8 = scalar_lea.vmem %s2076_s25, 256  ;;  %p2890_p7 = scmp.lt.s32.totalorder %s2076_s25, %s2076_s25 }
  0x77   :  { %2533 = vmatprep.subr.bf16.mxu1 %v2927_v0  ;;  %p2886_p6 = scmp.ne.s32.totalorder %s2076_s25, %s2885_s8  ;;  %p2891_p8 = scmp.lt.s32.totalorder %s2885_s8, %s2885_s8 }
  0x78   :  { %2260 = vmatmul.mubr.msk.f32.vlgmr.msra.gmra.mrb[0].mxu0 %vm130_vm2, %v128_v16 }
  0x79   :  { %2529 = vmatpush3.bf16.msra.mxu0 %v3103_v17  ;;  %2281 = vmatprep.mubr.msk.f32.mxu0 %vm2928_vm1, %v2929_v1  ;;  %p2892_p9 = por %p2891_p8, %p2890_p7 }
  0x7a   :  { %2271 = vmatmul.mubr.msk.f32.vlgmr.msra.gmra.mrb[0].mxu1 %vm130_vm2, %v128_v16  ;;  %2530 = vmatprep.subr.bf16.mxu0 %v2927_v0 }
  0x7b   :  { %2535 = vmatpush3.bf16.msra.mxu1 %v3090_v5  ;;  %2292 = vmatprep.mubr.msk.f32.mxu1 %vm2928_vm1, %v2929_v1  ;;  %p2893_p10 = pnand %p2892_p9, %p2886_p6 }
  0x7c   :  { %2536 = vmatprep.subr.bf16.mxu1 %v2927_v0 }
  0x7d   :  { %2532 = vmatpush3.bf16.msra.mxu0 %v3110_v20 }
  0x7e   :  { %2539 = vmatprep.subr.bf16.mxu0 %v2927_v0 }
  0x7f   :  { %2538 = vmatpush3.bf16.msra.mxu1 %v3093_v11 }
  0x80   :  { %2282 = vmatmul.mubr.msk.f32.vlgmr.msra.gmra.mrb[2].mxu0 %vm130_vm2, %v128_v16  ;;  %2545 = vmatprep.subr.bf16.mxu1 %v2927_v0 }
  0x81   :  { %2541 = vmatpush3.bf16.msra.mxu0 %v3095_v12  ;;  %2303 = vmatprep.mubr.msk.f32.mxu0 %vm2928_vm1, %v2929_v1 }
  0x82   :  { %2542 = vmatprep.subr.bf16.mxu0 %v2927_v0 }
  0x85   :  { %2544 = vmatpush3.bf16.msra.mxu0 %v3099_v15 }
  0x86   :  { %2551 = vmatprep.subr.bf16.mxu0 %v2927_v0 }
 0x14b   :  { %v200_v22 = vpop.f32.mrb[0].mxu0 }
 0x14c   :  { %v204_v24 = vadd.f32 %v200_v22, %v129_v21  ;;  %v2261_v25 = vpop.f32.mrb[1].mxu0 }
 0x14d   :  { %v278_v26 = vpop.f32.mrb[0].mxu1 }
 0x14e   :  { %v2091_v27 = vmul.f32 -1.442695, %v204_v24  ;;  %v282_v28 = vadd.f32 %v278_v26, %v211_v23  ;;  %v2272_v29 = vpop.f32.mrb[1].mxu1  ;;  %v700_v24 = vld [vmem:[#allocation6 + $0x4] sm:$0x3] }
 0x150   :  { %2673 = vpow2.f32 %v2091_v27  ;;  %v2093_v30 = vmul.f32 -1.442695, %v282_v28 }
 0x152   :  { %2675 = vpow2.f32 %v2093_v30 }
 0x153   :  { %v362_v31 = vpop.f32.mrb[2].mxu0 }
 0x154   :  { %v2283_v32 = vpop.f32.mrb[3].mxu0  ;;  %v363_v38 = vadd.f32 %v3134_v36, %v362_v31 }
 0x15a   :  { %v2674_v33 = vpop.eup %2673 }
 0x15b   :  { %v208_v34 = vadd.f32 1.0, %v2674_v33 }
 0x15c   :  { %v2676_v35 = vpop.eup %2675 }
 0x15d   :  { %2677 = vrcp.f32 %v208_v34  ;;  %v286_v37 = vadd.f32 1.0, %v2676_v35 }
 0x15f   :  { %2679 = vrcp.f32 %v286_v37 }
 0x167   :  { %v2678_v39 = vpop.eup %2677 }
 0x168   :  { %v366_v41 = vmul.f32 %v2678_v39, %v363_v38  ;;  %v779_v39 = vld [vmem:[#allocation8 + $0x4] sm:$0x3] }
 0x169   :  { %v2680_v43 = vpop.eup %2679 }
 0x16a   :  { %v367_v42 = vadd.f32 %v366_v41, %v289_v40  ;;  %v369_v44 = vsub.f32 1.0, %v2680_v43  ;;  %v371_v47 = vmul.f32 %v2680_v43, %v128_v16 }
 0x16c   :  { %2681 = vtanh.f32 %v367_v42 }
 0x176   :  { %v2682_v45 = vpop.eup %2681 }
 0x177   :  { %v370_v46 = vmul.f32 %v2682_v45, %v369_v44 }
 0x179   :  { %v372_v48 = vadd.f32 %v371_v47, %v370_v46 }
 0x17b   :  { %2293 = vmatmul.mubr.msk.f32.vlgmr.msra.gmra.mrb[2].mxu1 %vm130_vm2, %v372_v48  ;;  %374 = vst.msk [vmem:[#allocation14] sm:$0x3] %vm113_vm0, %v372_v48  ;;  %2304 = vmatmul.mubr.msk.f32.vlgmr.msra.gmra.mrb[4].mxu0 %vm130_vm2, %v372_v48 }
 0x17c   :  { %2547 = vmatpush3.bf16.msra.mxu1 %v3103_v17  ;;  %2314 = vmatprep.mubr.msk.f32.mxu1 %vm2928_vm1, %v2929_v1 }
 0x17d   :  { %2548 = vmatprep.subr.bf16.mxu1 %v2927_v0  ;;  %2553 = vmatpush3.bf16.msra.mxu0 %v3090_v5 }
 0x17e   :  { %2554 = vmatprep.subr.bf16.mxu0 %v2927_v0  ;;  %2325 = vmatprep.mubr.msk.f32.mxu0 %vm2928_vm1, %v2929_v1 }
 0x180   :  { %2550 = vmatpush3.bf16.msra.mxu1 %v3110_v20 }
 0x181   :  { %2557 = vmatprep.subr.bf16.mxu1 %v2927_v0  ;;  %2556 = vmatpush3.bf16.msra.mxu0 %v3093_v11 }
 0x182   :  { %2563 = vmatprep.subr.bf16.mxu0 %v2927_v0 }
 0x183   :  { %2315 = vmatmul.mubr.msk.f32.vlgmr.msra.gmra.mrb[4].mxu1 %vm130_vm2, %v372_v48 }
 0x184   :  { %2559 = vmatpush3.bf16.msra.mxu1 %v3095_v12  ;;  %2336 = vmatprep.mubr.msk.f32.mxu1 %vm2928_vm1, %v2929_v1 }
 0x185   :  { %2560 = vmatprep.subr.bf16.mxu1 %v2927_v0 }
 0x188   :  { %2562 = vmatpush3.bf16.msra.mxu1 %v3099_v15 }
 0x189   :  { %2569 = vmatprep.subr.bf16.mxu1 %v2927_v0 }
 0x24e   :  { %v446_v50 = vpop.f32.mrb[2].mxu1  ;;  %v525_v51 = vpop.f32.mrb[4].mxu0 }
 0x24f   :  { %v450_v52 = vadd.f32 %v446_v50, %v376_v49  ;;  %v2294_v54 = vpop.f32.mrb[3].mxu1  ;;  %v2305_v55 = vpop.f32.mrb[5].mxu0  ;;  %v529_v57 = vadd.f32 %v525_v51, %v458_v53 }
 0x251   :  { %v2097_v56 = vmul.f32 -1.442695, %v450_v52  ;;  %v2099_v58 = vmul.f32 -1.442695, %v529_v57  ;;  %v942_v52 = vld [vmem:[#allocation6 + $0x6] sm:$0x3] }
 0x253   :  { %2683 = vpow2.f32 %v2097_v56 }
 0x254   :  { %2685 = vpow2.f32 %v2099_v58 }
 0x256   :  { %v604_v59 = vpop.f32.mrb[4].mxu1 }
 0x257   :  { %v2316_v60 = vpop.f32.mrb[5].mxu1  ;;  %v605_v3 = vadd.f32 %v3134_v36, %v604_v59 }
 0x25d   :  { %v2684_v61 = vpop.eup %2683 }
 0x25e   :  { %v454_v62 = vadd.f32 1.0, %v2684_v61  ;;  %v2686_v63 = vpop.eup %2685 }
 0x25f   :  { %v533_v2 = vadd.f32 1.0, %v2686_v63 }
 0x260   :  { %2687 = vrcp.f32 %v454_v62 }
 0x261   :  { %2689 = vrcp.f32 %v533_v2 }
 0x26a   :  { %v2688_v4 = vpop.eup %2687 }
 0x26b   :  { %v608_v7 = vmul.f32 %v2688_v4, %v605_v3  ;;  %v2690_v9 = vpop.eup %2689  ;;  %v1021_v4 = vld [vmem:[#allocation8 + $0x6] sm:$0x3] }
 0x26c   :  { %v611_v10 = vsub.f32 1.0, %v2690_v9  ;;  %v613_v16 = vmul.f32 %v2690_v9, %v372_v48  ;;  %v860_v48 = vld [vmem:[#allocation3 + $0x6] sm:$0x3] }
 0x26d   :  { %v609_v8 = vadd.f32 %v608_v7, %v537_v6 }
 0x26f   :  { %2691 = vtanh.f32 %v609_v8 }
 0x279   :  { %v2692_v13 = vpop.eup %2691 }
 0x27a   :  { %v612_v14 = vmul.f32 %v2692_v13, %v611_v10 }
 0x27c   :  { %v614_v18 = vadd.f32 %v613_v16, %v612_v14 }
 0x27e   :  { %2326 = vmatmul.mubr.msk.f32.vlgmr.msra.gmra.mrb[6].mxu0 %vm130_vm2, %v614_v18  ;;  %616 = vst.msk [vmem:[#allocation14 + $0x2] sm:$0x3] %vm113_vm0, %v614_v18  ;;  %2337 = vmatmul.mubr.msk.f32.vlgmr.msra.gmra.mrb[6].mxu1 %vm130_vm2, %v614_v18 }
 0x27f   :  { %2565 = vmatpush3.bf16.msra.mxu0 %v3103_v17  ;;  %2347 = vmatprep.mubr.msk.f32.mxu0 %vm2928_vm1, %v2929_v1 }
 0x280   :  { %2566 = vmatprep.subr.bf16.mxu0 %v2927_v0  ;;  %2571 = vmatpush3.bf16.msra.mxu1 %v3090_v5 }
 0x281   :  { %2572 = vmatprep.subr.bf16.mxu1 %v2927_v0  ;;  %2358 = vmatprep.mubr.msk.f32.mxu1 %vm2928_vm1, %v2929_v1 }
 0x283   :  { %2568 = vmatpush3.bf16.msra.mxu0 %v3110_v20 }
 0x284   :  { %2575 = vmatprep.subr.bf16.mxu0 %v2927_v0  ;;  %2574 = vmatpush3.bf16.msra.mxu1 %v3093_v11 }
 0x285   :  { %2581 = vmatprep.subr.bf16.mxu1 %v2927_v0 }
 0x286   :  { %2348 = vmatmul.mubr.msk.f32.vlgmr.msra.gmra.mrb[8].mxu0 %vm130_vm2, %v614_v18 }
 0x287   :  { %2577 = vmatpush3.bf16.msra.mxu0 %v3095_v12  ;;  %2369 = vmatprep.mubr.msk.f32.mxu0 %vm2928_vm1, %v2929_v1 }
 0x288   :  { %2578 = vmatprep.subr.bf16.mxu0 %v2927_v0 }
 0x28b   :  { %2580 = vmatpush3.bf16.msra.mxu0 %v3099_v15 }
 0x28c   :  { %2587 = vmatprep.subr.bf16.mxu0 %v2927_v0 }
 0x351   :  { %v688_v21 = vpop.f32.mrb[6].mxu0  ;;  %v767_v22 = vpop.f32.mrb[6].mxu1 }
 0x352   :  { %v692_v23 = vadd.f32 %v688_v21, %v618_v19  ;;  %v2327_v25 = vpop.f32.mrb[7].mxu0  ;;  %v2338_v26 = vpop.f32.mrb[7].mxu1  ;;  %v771_v28 = vadd.f32 %v767_v22, %v700_v24 }
 0x354   :  { %v2102_v27 = vmul.f32 -1.442695, %v692_v23  ;;  %v2104_v29 = vmul.f32 -1.442695, %v771_v28  ;;  %v1184_v23 = vld [vmem:[#allocation6 + $0x8] sm:$0x3] }
 0x356   :  { %2693 = vpow2.f32 %v2102_v27 }
 0x357   :  { %2695 = vpow2.f32 %v2104_v29 }
 0x359   :  { %v846_v30 = vpop.f32.mrb[8].mxu0 }
 0x35a   :  { %v2349_v31 = vpop.f32.mrb[9].mxu0  ;;  %v847_v37 = vadd.f32 %v3134_v36, %v846_v30 }
 0x360   :  { %v2694_v32 = vpop.eup %2693 }
 0x361   :  { %v696_v33 = vadd.f32 1.0, %v2694_v32  ;;  %v2696_v34 = vpop.eup %2695 }
 0x362   :  { %v775_v35 = vadd.f32 1.0, %v2696_v34 }
 0x363   :  { %2697 = vrcp.f32 %v696_v33 }
 0x364   :  { %2699 = vrcp.f32 %v775_v35 }
 0x36d   :  { %v2698_v38 = vpop.eup %2697 }
 0x36e   :  { %v850_v40 = vmul.f32 %v2698_v38, %v847_v37  ;;  %v2700_v42 = vpop.eup %2699  ;;  %v1263_v38 = vld [vmem:[#allocation8 + $0x8] sm:$0x3] }
 0x36f   :  { %v853_v43 = vsub.f32 1.0, %v2700_v42  ;;  %v855_v46 = vmul.f32 %v2700_v42, %v614_v18  ;;  %v1102_v18 = vld [vmem:[#allocation3 + $0x8] sm:$0x3] }
 0x370   :  { %v851_v41 = vadd.f32 %v850_v40, %v779_v39 }
 0x372   :  { %2701 = vtanh.f32 %v851_v41 }
 0x37c   :  { %v2702_v44 = vpop.eup %2701 }
 0x37d   :  { %v854_v45 = vmul.f32 %v2702_v44, %v853_v43 }
 0x37f   :  { %v856_v47 = vadd.f32 %v855_v46, %v854_v45 }
 0x381   :  { %2359 = vmatmul.mubr.msk.f32.vlgmr.msra.gmra.mrb[8].mxu1 %vm130_vm2, %v856_v47  ;;  %858 = vst.msk [vmem:[#allocation14 + $0x4] sm:$0x3] %vm113_vm0, %v856_v47  ;;  %2370 = vmatmul.mubr.msk.f32.vlgmr.msra.gmra.mrb[10].mxu0 %vm130_vm2, %v856_v47 }
 0x382   :  { %2583 = vmatpush3.bf16.msra.mxu1 %v3103_v17  ;;  %2380 = vmatprep.mubr.msk.f32.mxu1 %vm2928_vm1, %v2929_v1 }
 0x383   :  { %2584 = vmatprep.subr.bf16.mxu1 %v2927_v0  ;;  %2589 = vmatpush3.bf16.msra.mxu0 %v3090_v5 }
 0x384   :  { %2590 = vmatprep.subr.bf16.mxu0 %v2927_v0  ;;  %2391 = vmatprep.mubr.msk.f32.mxu0 %vm2928_vm1, %v2929_v1 }
 0x386   :  { %2586 = vmatpush3.bf16.msra.mxu1 %v3110_v20 }
 0x387   :  { %2593 = vmatprep.subr.bf16.mxu1 %v2927_v0  ;;  %2592 = vmatpush3.bf16.msra.mxu0 %v3093_v11 }
 0x388   :  { %2599 = vmatprep.subr.bf16.mxu0 %v2927_v0 }
 0x389   :  { %2381 = vmatmul.mubr.msk.f32.vlgmr.msra.gmra.mrb[10].mxu1 %vm130_vm2, %v856_v47 }
 0x38a   :  { %2595 = vmatpush3.bf16.msra.mxu1 %v3095_v12  ;;  %2402 = vmatprep.mubr.msk.f32.mxu1 %vm2928_vm1, %v2929_v1 }
 0x38b   :  { %2596 = vmatprep.subr.bf16.mxu1 %v2927_v0 }
 0x38e   :  { %2598 = vmatpush3.bf16.msra.mxu1 %v3099_v15 }
 0x38f   :  { %2605 = vmatprep.subr.bf16.mxu1 %v2927_v0 }
 0x454   :  { %v930_v49 = vpop.f32.mrb[8].mxu1  ;;  %v1009_v50 = vpop.f32.mrb[10].mxu0 }
 0x455   :  { %v934_v51 = vadd.f32 %v930_v49, %v860_v48  ;;  %v2360_v53 = vpop.f32.mrb[9].mxu1  ;;  %v2371_v54 = vpop.f32.mrb[11].mxu0  ;;  %v1013_v56 = vadd.f32 %v1009_v50, %v942_v52 }
 0x457   :  { %v2107_v55 = vmul.f32 -1.442695, %v934_v51  ;;  %v2109_v57 = vmul.f32 -1.442695, %v1013_v56  ;;  %v1426_v51 = vld [vmem:[#allocation6 + $0xa] sm:$0x3] }
 0x459   :  { %2703 = vpow2.f32 %v2107_v55 }
 0x45a   :  { %2705 = vpow2.f32 %v2109_v57 }
 0x45c   :  { %v1088_v58 = vpop.f32.mrb[10].mxu1 }
 0x45d   :  { %v2382_v59 = vpop.f32.mrb[11].mxu1  ;;  %v1089_v2 = vadd.f32 %v3134_v36, %v1088_v58 }
 0x463   :  { %v2704_v60 = vpop.eup %2703 }
 0x464   :  { %v938_v61 = vadd.f32 1.0, %v2704_v60  ;;  %v2706_v62 = vpop.eup %2705 }
 0x465   :  { %v1017_v63 = vadd.f32 1.0, %v2706_v62 }
 0x466   :  { %2707 = vrcp.f32 %v938_v61 }
 0x467   :  { %2709 = vrcp.f32 %v1017_v63 }
 0x470   :  { %v2708_v3 = vpop.eup %2707 }
 0x471   :  { %v1092_v6 = vmul.f32 %v2708_v3, %v1089_v2  ;;  %v2710_v8 = vpop.eup %2709  ;;  %v1505_v3 = vld [vmem:[#allocation8 + $0xa] sm:$0x3] }
 0x472   :  { %v1095_v9 = vsub.f32 1.0, %v2710_v8  ;;  %v1097_v14 = vmul.f32 %v2710_v8, %v856_v47  ;;  %v1344_v47 = vld [vmem:[#allocation3 + $0xa] sm:$0x3] }
 0x473   :  { %v1093_v7 = vadd.f32 %v1092_v6, %v1021_v4 }
 0x475   :  { %2711 = vtanh.f32 %v1093_v7 }
 0x47f   :  { %v2712_v10 = vpop.eup %2711 }
 0x480   :  { %v1096_v13 = vmul.f32 %v2712_v10, %v1095_v9 }
 0x482   :  { %v1098_v16 = vadd.f32 %v1097_v14, %v1096_v13 }
 0x484   :  { %2392 = vmatmul.mubr.msk.f32.vlgmr.msra.gmra.mrb[12].mxu0 %vm130_vm2, %v1098_v16  ;;  %1100 = vst.msk [vmem:[#allocation14 + $0x6] sm:$0x3] %vm113_vm0, %v1098_v16  ;;  %2403 = vmatmul.mubr.msk.f32.vlgmr.msra.gmra.mrb[12].mxu1 %vm130_vm2, %v1098_v16 }
 0x485   :  { %2601 = vmatpush3.bf16.msra.mxu0 %v3103_v17  ;;  %2413 = vmatprep.mubr.msk.f32.mxu0 %vm2928_vm1, %v2929_v1 }
 0x486   :  { %2602 = vmatprep.subr.bf16.mxu0 %v2927_v0  ;;  %2607 = vmatpush3.bf16.msra.mxu1 %v3090_v5 }
 0x487   :  { %2608 = vmatprep.subr.bf16.mxu1 %v2927_v0  ;;  %2424 = vmatprep.mubr.msk.f32.mxu1 %vm2928_vm1, %v2929_v1 }
 0x489   :  { %2604 = vmatpush3.bf16.msra.mxu0 %v3110_v20 }
 0x48a   :  { %2611 = vmatprep.subr.bf16.mxu0 %v2927_v0  ;;  %2610 = vmatpush3.bf16.msra.mxu1 %v3093_v11 }
 0x48b   :  { %2617 = vmatprep.subr.bf16.mxu1 %v2927_v0 }
 0x48c   :  { %2414 = vmatmul.mubr.msk.f32.vlgmr.msra.gmra.mrb[14].mxu0 %vm130_vm2, %v1098_v16 }
 0x48d   :  { %2613 = vmatpush3.bf16.msra.mxu0 %v3095_v12  ;;  %2435 = vmatprep.mubr.msk.f32.mxu0 %vm2928_vm1, %v2929_v1 }
 0x48e   :  { %2614 = vmatprep.subr.bf16.mxu0 %v2927_v0 }
 0x491   :  { %2616 = vmatpush3.bf16.msra.mxu0 %v3099_v15 }
 0x492   :  { %2623 = vmatprep.subr.bf16.mxu0 %v2927_v0 }
 0x557   :  { %v1172_v19 = vpop.f32.mrb[12].mxu0  ;;  %v1251_v21 = vpop.f32.mrb[12].mxu1 }
 0x558   :  { %v1176_v22 = vadd.f32 %v1172_v19, %v1102_v18  ;;  %v2393_v24 = vpop.f32.mrb[13].mxu0  ;;  %v2404_v25 = vpop.f32.mrb[13].mxu1  ;;  %v1255_v27 = vadd.f32 %v1251_v21, %v1184_v23  ;;  %v1668_v21 = vld [vmem:[#allocation6 + $0xc] sm:$0x3] }
 0x55a   :  { %v2112_v26 = vmul.f32 -1.442695, %v1176_v22  ;;  %v2114_v28 = vmul.f32 -1.442695, %v1255_v27 }
 0x55c   :  { %2713 = vpow2.f32 %v2112_v26 }
 0x55d   :  { %2715 = vpow2.f32 %v2114_v28 }
 0x55f   :  { %v1330_v29 = vpop.f32.mrb[14].mxu0 }
 0x560   :  { %v2415_v30 = vpop.f32.mrb[15].mxu0  ;;  %v1331_v35 = vadd.f32 %v3134_v36, %v1330_v29 }
 0x566   :  { %v2714_v31 = vpop.eup %2713 }
 0x567   :  { %v1180_v32 = vadd.f32 1.0, %v2714_v31  ;;  %v2716_v33 = vpop.eup %2715 }
 0x568   :  { %v1259_v34 = vadd.f32 1.0, %v2716_v33 }
 0x569   :  { %2717 = vrcp.f32 %v1180_v32  ;;  %v1747_v32 = vld [vmem:[#allocation8 + $0xc] sm:$0x3] }
 0x56a   :  { %2719 = vrcp.f32 %v1259_v34 }
 0x573   :  { %v2718_v37 = vpop.eup %2717 }
 0x574   :  { %v1334_v39 = vmul.f32 %v2718_v37, %v1331_v35  ;;  %v2720_v41 = vpop.eup %2719 }
 0x575   :  { %v1337_v42 = vsub.f32 1.0, %v2720_v41  ;;  %v1339_v45 = vmul.f32 %v2720_v41, %v1098_v16 }
 0x576   :  { %v1335_v40 = vadd.f32 %v1334_v39, %v1263_v38 }
 0x578   :  { %2721 = vtanh.f32 %v1335_v40 }
 0x582   :  { %v2722_v43 = vpop.eup %2721 }
 0x583   :  { %v1338_v44 = vmul.f32 %v2722_v43, %v1337_v42  ;;  %v1828_v42 = vld [vmem:[#allocation3 + $0xe] sm:$0x3] }
 0x585   :  { %v1340_v46 = vadd.f32 %v1339_v45, %v1338_v44 }
 0x587   :  { %2425 = vmatmul.mubr.msk.f32.vlgmr.msra.gmra.mrb[14].mxu1 %vm130_vm2, %v1340_v46  ;;  %1342 = vst.msk [vmem:[#allocation14 + $0x8] sm:$0x3] %vm113_vm0, %v1340_v46  ;;  %2436 = vmatmul.mubr.msk.f32.vlgmr.msra.gmra.mrb[16].mxu0 %vm130_vm2, %v1340_v46 }
 0x588   :  { %2619 = vmatpush3.bf16.msra.mxu1 %v3103_v17  ;;  %2446 = vmatprep.mubr.msk.f32.mxu1 %vm2928_vm1, %v2929_v1 }
 0x589   :  { %2620 = vmatprep.subr.bf16.mxu1 %v2927_v0  ;;  %2625 = vmatpush3.bf16.msra.mxu0 %v3090_v5 }
 0x58a   :  { %2626 = vmatprep.subr.bf16.mxu0 %v2927_v0  ;;  %2457 = vmatprep.mubr.msk.f32.mxu0 %vm2928_vm1, %v2929_v1 }
 0x58c   :  { %2622 = vmatpush3.bf16.msra.mxu1 %v3110_v20 }
 0x58d   :  { %2629 = vmatprep.subr.bf16.mxu1 %v2927_v0  ;;  %2628 = vmatpush3.bf16.msra.mxu0 %v3093_v11 }
 0x58e   :  { %2635 = vmatprep.subr.bf16.mxu0 %v2927_v0 }
 0x58f   :  { %2447 = vmatmul.mubr.msk.f32.vlgmr.msra.gmra.mrb[16].mxu1 %vm130_vm2, %v1340_v46 }
 0x590   :  { %2631 = vmatpush3.bf16.msra.mxu1 %v3095_v12  ;;  %2468 = vmatprep.mubr.msk.f32.mxu1 %vm2928_vm1, %v2929_v1 }
 0x591   :  { %2632 = vmatprep.subr.bf16.mxu1 %v2927_v0 }
 0x594   :  { %2634 = vmatpush3.bf16.msra.mxu1 %v3099_v15 }
 0x595   :  { %2641 = vmatprep.subr.bf16.mxu1 %v2927_v0 }
 0x65a   :  { %v1414_v48 = vpop.f32.mrb[14].mxu1  ;;  %v1493_v49 = vpop.f32.mrb[16].mxu0 }
 0x65b   :  { %v1418_v50 = vadd.f32 %v1414_v48, %v1344_v47  ;;  %v2426_v52 = vpop.f32.mrb[15].mxu1  ;;  %v2437_v53 = vpop.f32.mrb[17].mxu0  ;;  %v1497_v55 = vadd.f32 %v1493_v49, %v1426_v51 }
 0x65d   :  { %v2117_v54 = vmul.f32 -1.442695, %v1418_v50  ;;  %v2119_v56 = vmul.f32 -1.442695, %v1497_v55 }
 0x65f   :  { %2723 = vpow2.f32 %v2117_v54 }
 0x660   :  { %2725 = vpow2.f32 %v2119_v56  ;;  %v1989_v56 = vld [vmem:[#allocation8 + $0xe] sm:$0x3] }
 0x662   :  { %v1572_v57 = vpop.f32.mrb[16].mxu1 }
 0x663   :  { %v2448_v58 = vpop.f32.mrb[17].mxu1  ;;  %v1573_v63 = vadd.f32 %v3134_v36, %v1572_v57 }
 0x669   :  { %v2724_v59 = vpop.eup %2723 }
 0x66a   :  { %v1422_v60 = vadd.f32 1.0, %v2724_v59  ;;  %v2726_v61 = vpop.eup %2725 }
 0x66b   :  { %v1501_v62 = vadd.f32 1.0, %v2726_v61 }
 0x66c   :  { %2727 = vrcp.f32 %v1422_v60 }
 0x66d   :  { %2729 = vrcp.f32 %v1501_v62 }
 0x676   :  { %v2728_v2 = vpop.eup %2727 }
 0x677   :  { %v1576_v4 = vmul.f32 %v2728_v2, %v1573_v63  ;;  %v2730_v7 = vpop.eup %2729 }
 0x678   :  { %v1579_v8 = vsub.f32 1.0, %v2730_v7  ;;  %v1581_v13 = vmul.f32 %v2730_v7, %v1340_v46  ;;  %v1910_v46 = vld [vmem:[#allocation6 + $0xe] sm:$0x3] }
 0x679   :  { %v1577_v6 = vadd.f32 %v1576_v4, %v1505_v3 }
 0x67b   :  { %2731 = vtanh.f32 %v1577_v6 }
 0x685   :  { %v2732_v9 = vpop.eup %2731 }
 0x686   :  { %v1580_v10 = vmul.f32 %v2732_v9, %v1579_v8 }
 0x688   :  { %v1582_v14 = vadd.f32 %v1581_v13, %v1580_v10 }
 0x68a   :  { %2458 = vmatmul.mubr.msk.f32.vlgmr.msra.gmra.mrb[18].mxu0 %vm130_vm2, %v1582_v14  ;;  %1584 = vst.msk [vmem:[#allocation14 + $0xa] sm:$0x3] %vm113_vm0, %v1582_v14  ;;  %2469 = vmatmul.mubr.msk.f32.vlgmr.msra.gmra.mrb[18].mxu1 %vm130_vm2, %v1582_v14 }
 0x68b   :  { %2637 = vmatpush3.bf16.msra.mxu0 %v3103_v17  ;;  %2479 = vmatprep.mubr.msk.f32.mxu0 %vm2928_vm1, %v2929_v1 }
 0x68c   :  { %2638 = vmatprep.subr.bf16.mxu0 %v2927_v0  ;;  %2643 = vmatpush3.bf16.msra.mxu1 %v3090_v5  ;;  %v1586_v5 = vld [vmem:[#allocation3 + $0xc] sm:$0x3] }
 0x68d   :  { %2644 = vmatprep.subr.bf16.mxu1 %v2927_v0  ;;  %2490 = vmatprep.mubr.msk.f32.mxu1 %vm2928_vm1, %v2929_v1 }
 0x68f   :  { %2640 = vmatpush3.bf16.msra.mxu0 %v3110_v20 }
 0x690   :  { %2647 = vmatprep.subr.bf16.mxu0 %v2927_v0  ;;  %2646 = vmatpush3.bf16.msra.mxu1 %v3093_v11 }
 0x691   :  { %2653 = vmatprep.subr.bf16.mxu1 %v2927_v0 }
 0x692   :  { %2480 = vmatmul.mubr.msk.f32.vlgmr.msra.gmra.mrb[20].mxu0 %vm130_vm2, %v1582_v14 }
 0x693   :  { %2649 = vmatpush3.bf16.msra.mxu0 %v3095_v12  ;;  %2501 = vmatprep.mubr.msk.f32.mxu0 %vm2928_vm1, %v2929_v1 }
 0x694   :  { %2650 = vmatprep.subr.bf16.mxu0 %v2927_v0 }
 0x697   :  { %2652 = vmatpush3.bf16.msra.mxu0 %v3099_v15 }
 0x75d   :  { %v1656_v16 = vpop.f32.mrb[18].mxu0  ;;  %v1735_v18 = vpop.f32.mrb[18].mxu1 }
 0x75e   :  { %v1660_v19 = vadd.f32 %v1656_v16, %v1586_v5  ;;  %v2459_v22 = vpop.f32.mrb[19].mxu0  ;;  %v2470_v11 = vpop.f32.mrb[19].mxu1  ;;  %v1739_v24 = vadd.f32 %v1735_v18, %v1668_v21 }
 0x760   :  { %v2122_v23 = vmul.f32 -1.442695, %v1660_v19  ;;  %v2124_v25 = vmul.f32 -1.442695, %v1739_v24 }
 0x762   :  { %2733 = vpow2.f32 %v2122_v23 }
 0x763   :  { %2735 = vpow2.f32 %v2124_v25 }
 0x765   :  { %v1814_v26 = vpop.f32.mrb[20].mxu0 }
 0x766   :  { %v2481_v12 = vpop.f32.mrb[21].mxu0  ;;  %v1815_v15 = vadd.f32 %v3134_v36, %v1814_v26 }
 0x76c   :  { %v2734_v27 = vpop.eup %2733 }
 0x76d   :  { %v1664_v28 = vadd.f32 1.0, %v2734_v27  ;;  %v2736_v29 = vpop.eup %2735 }
 0x76e   :  { %v1743_v30 = vadd.f32 1.0, %v2736_v29 }
 0x76f   :  { %2737 = vrcp.f32 %v1664_v28 }
 0x770   :  { %2739 = vrcp.f32 %v1743_v30 }
 0x779   :  { %v2738_v31 = vpop.eup %2737 }
 0x77a   :  { %v1818_v33 = vmul.f32 %v2738_v31, %v1815_v15  ;;  %v2740_v35 = vpop.eup %2739 }
 0x77b   :  { %v1821_v37 = vsub.f32 1.0, %v2740_v35  ;;  %v1823_v40 = vmul.f32 %v2740_v35, %v1582_v14 }
 0x77c   :  { %v1819_v34 = vadd.f32 %v1818_v33, %v1747_v32 }
 0x77e   :  { %2741 = vtanh.f32 %v1819_v34 }
 0x788   :  { %v2742_v38 = vpop.eup %2741 }
 0x789   :  { %v1822_v39 = vmul.f32 %v2742_v38, %v1821_v37 }
 0x78b   :  { %v1824_v41 = vadd.f32 %v1823_v40, %v1822_v39 }
 0x78d   :  { %2491 = vmatmul.mubr.msk.f32.vlgmr.msra.gmra.mrb[20].mxu1 %vm130_vm2, %v1824_v41  ;;  %1826 = vst.msk [vmem:[#allocation14 + $0xc] sm:$0x3] %vm113_vm0, %v1824_v41  ;;  %2502 = vmatmul.mubr.msk.f32.vlgmr.msra.gmra.mrb[22].mxu0 %vm130_vm2, %v1824_v41 }
 0x78e   :  { %2655 = vmatpush3.bf16.msra.mxu1 %v3103_v17  ;;  %2512 = vmatprep.mubr.msk.f32.mxu1 %vm2928_vm1, %v2929_v1 }
 0x78f   :  { %2656 = vmatprep.subr.bf16.mxu1 %v2927_v0 }
 0x792   :  { %2658 = vmatpush3.bf16.msra.mxu1 %v3110_v20 }
 0x795   :  { %2513 = vmatmul.mubr.msk.f32.vlgmr.msra.gmra.mrb[22].mxu1 %vm130_vm2, %v1824_v41 }
 0x860   :  { %v1898_v43 = vpop.f32.mrb[20].mxu1  ;;  %v1977_v44 = vpop.f32.mrb[22].mxu0 }
 0x861   :  { %v1902_v45 = vadd.f32 %v1898_v43, %v1828_v42  ;;  %v2492_v47 = vpop.f32.mrb[21].mxu1  ;;  %v2503_v48 = vpop.f32.mrb[23].mxu0  ;;  %v1981_v50 = vadd.f32 %v1977_v44, %v1910_v46 }
 0x863   :  { %v2127_v49 = vmul.f32 -1.442695, %v1902_v45  ;;  %v2129_v17 = vmul.f32 -1.442695, %v1981_v50 }
 0x865   :  { %2743 = vpow2.f32 %v2127_v49 }
 0x866   :  { %2745 = vpow2.f32 %v2129_v17 }
 0x868   :  { %v2056_v51 = vpop.f32.mrb[22].mxu1 }
 0x869   :  { %v2514_v52 = vpop.f32.mrb[23].mxu1  ;;  %v2057_v54 = vadd.f32 %v3134_v36, %v2056_v51 }
 0x86f   :  { %v2744_v1 = vpop.eup %2743 }
 0x870   :  { %v1906_v0 = vadd.f32 1.0, %v2744_v1  ;;  %v2746_v20 = vpop.eup %2745 }
 0x871   :  { %v1985_v53 = vadd.f32 1.0, %v2746_v20 }
 0x872   :  { %2747 = vrcp.f32 %v1906_v0 }
 0x873   :  { %2749 = vrcp.f32 %v1985_v53 }
 0x87c   :  { %v2748_v55 = vpop.eup %2747 }
 0x87d   :  { %v2060_v57 = vmul.f32 %v2748_v55, %v2057_v54  ;;  %v2750_v59 = vpop.eup %2749 }
 0x87e   :  { %v2063_v60 = vsub.f32 1.0, %v2750_v59  ;;  %v2065_v62 = vmul.f32 %v2750_v59, %v1824_v41 }
 0x87f   :  { %v2061_v58 = vadd.f32 %v2060_v57, %v1989_v56 }
 0x881   :  { %2751 = vtanh.f32 %v2061_v58 }
 0x88b   :  { %v2752_v61 = vpop.eup %2751 }
 0x88c   :  { %v2064_v63 = vmul.f32 %v2752_v61, %v2063_v60 }
 0x88e   :  { %v2066_v2 = vadd.f32 %v2065_v62, %v2064_v63 }
 0x890   :  { %2068 = vst.msk [vmem:[#allocation14 + $0xe] sm:$0x3] %vm113_vm0, %v2066_v2  ;;  %2069 = vst.msk [vmem:[#allocation2] sm:$0x3] %vm113_vm0, %v2066_v2 }
 0x891   :  { %2896 = shalt.err (!%p2893_p10)
}
 0x892   :  { %s2897_s12 = scalar_lea.hbm %s3308_s7, 256 }
 0x893   :  { %p2898_p11 = scmp.ne.s32.totalorder %s3308_s7, %s2897_s12  ;;  %p2901_p12 = scmp.lt.u32.totalorder %s2897_s12, %s3308_s7 }
 0x895   :  { %p2903_p13 = pnand %p2901_p12, %p2898_p11 }
 0x897   :  { %2906 = shalt.err (!%p2903_p13)
}
 0x898   :  { %2081 = dma.vmem_to_hbm [thread:$0]  %s2076_s25, 256, %s3308_s7, [#allocation5], %s2919_s13, %s2919_s13, %s2920_s14  }
 0x899   :  { %2915 = dma.done.wait [#allocation5], 256  }
 0x89a   :  { %2916 = vsyncadd [#allocation5], 4294967040 }
 0x89b   :  { %2085 = vsyncpa [#allocation4], 1 }
 0x89c   :  { %2086 = vsyncpa [#allocation7], 1 }
 0x89d   :  { %2087 = vsyncpa [#allocation10], 1 }
 0x89e   :  { %2088 = vsyncpa [#allocation13], 1 }
 0x89f   :  { %2089 = vsyncpa [#allocation5], 1 }

</bundles_post_ra>
